<compile_context>
chip_gen: v6e
topology: v6e:2x2x1
jax: 0.10.0
libtpu: 0.0.40
codegen_flags: <defaults>
</compile_context>

<pallas_src>
import jax
import jax.numpy as jnp
import numpy as np
from jax import lax
from jax.experimental import pallas as pl
from jax.experimental.pallas import tpu as pltpu

# ---------------- configuration (small, consistent with the module) ----------------
DX, DY = 1, 1
DIN = DX + DY          # transformer in_dim = dx + dy
DIM = 32               # dT
NUM_HEADS = 4
HEAD_DIM = DIM // NUM_HEADS
NUM_LAYERS = 2
DOUT = 8               # stand-in for eval_model.count_params()
SEQ = 8                # S  (max set length)
BATCH = 2              # N
TOK = SEQ + 1          # CLS + S
T_PAD = 16             # tokens padded to a sublane-friendly count
DOUT_PAD = 128         # lane-dense output store
DEC_ROWS = 8           # decoder applied to first 8 rows only (row 0 = CLS), aligned store
EPS = 1e-5
NEG = -1e30


def _layernorm(x, g, b):
    mu = jnp.mean(x, axis=-1, keepdims=True)
    var = jnp.mean((x - mu) ** 2, axis=-1, keepdims=True)
    return (x - mu) * lax.rsqrt(var + EPS) * g + b


def _bf(x):
    return x.astype(jnp.bfloat16)


def _dot(a, b):
    return jnp.dot(a, b, preferred_element_type=jnp.float32)


# ---------------- Pallas kernel: full transformer for ONE example --------------------
def incontext_kernel(x_ref, c_ref, w_ref, ff2_ref, dec_ref, o_ref, attn_sc):
    # ---- unpack global constants (encoder / CLS / decoder bias) ----
    glob = c_ref[NUM_LAYERS]                                # [8, 128] f32
    cls = glob[0:1, 0:DIM]                                  # [1, DIM]
    b_enc = glob[1:2, 0:DIM]
    w_enc = glob[2:2 + DIN, 0:DIM]                          # [DIN, DIM]
    b_dec = glob[4:5, :]                                    # [1, DOUT_PAD]

    # ---- in-kernel input encoder (Linear 2->32) + CLS write -----------------------
    # row 0 of x is a zero placeholder for CLS; rows TOK..T_PAD-1 are padding tokens.
    x = x_ref[0]                                            # [T_PAD, DIN] f32
    enc = x[:, 0:1] * w_enc[0:1, :] + x[:, 1:2] * w_enc[1:2, :] + b_enc
    ridx = lax.broadcasted_iota(jnp.int32, (T_PAD, 1), 0)
    emb = jnp.where(ridx == 0, cls, enc)                    # [T_PAD, DIM] f32

    # additive key-validity bias (padding key tokens masked out); built once per step
    cidx = lax.broadcasted_iota(jnp.int32, (1, T_PAD), 1)
    kbias = jnp.where(cidx < TOK, 0.0, NEG).astype(jnp.float32)

    for l in range(NUM_LAYERS):                             # static unroll
        wl = w_ref[l]                                       # [DIM, 8*DIM] bf16
        cb = c_ref[l]                                       # [8, 128] f32
        b_qkv = cb[0:1, 0:3 * DIM]
        b_out = cb[1:2, 0:DIM]
        ln1_g = cb[2:3, 0:DIM]
        ln1_b = cb[3:4, 0:DIM]
        b_ff1 = cb[4:5, :]
        b_ff2 = cb[5:6, 0:DIM]
        ln2_g = cb[6:7, 0:DIM]
        ln2_b = cb[7:8, 0:DIM]

        # ---- multi-head self attention (1/sqrt(head_dim) folded into qkv slab) ----
        qkv = _dot(_bf(emb), wl[:, 0:3 * DIM]) + b_qkv      # [T_PAD, 3*DIM] f32
        q = _bf(qkv[:, 0:DIM])
        k = qkv[:, DIM:2 * DIM]
        v = _bf(qkv[:, 2 * DIM:3 * DIM])
        kT = _bf(jnp.transpose(k))                          # single transpose / layer

        for h in range(NUM_HEADS):                          # static unroll
            sl = slice(h * HEAD_DIM, (h + 1) * HEAD_DIM)
            s = _dot(q[:, sl], kT[sl, :]) + kbias           # [T_PAD, T_PAD] f32
            s = s - jnp.max(s, axis=-1, keepdims=True)
            p = jnp.exp(s)
            p = p * pl.reciprocal(jnp.sum(p, axis=-1, keepdims=True), approx=True)
            attn_sc[:, sl] = _dot(_bf(p), v[:, sl])         # write head slice to scratch

        attn = _dot(_bf(attn_sc[...]), wl[:, 3 * DIM:4 * DIM]) + b_out

        # ---- post-norm residual blocks (all elementwise math in f32) ----
        src = _layernorm(emb + attn, ln1_g, ln1_b)
        ff = jnp.maximum(_dot(_bf(src), wl[:, 4 * DIM:8 * DIM]) + b_ff1, 0.0)
        ff = _dot(_bf(ff), ff2_ref[l]) + b_ff2
        emb = _layernorm(src + ff, ln2_g, ln2_b)

    # ---- decoder on first DEC_ROWS rows only (row 0 = CLS); lane-dense [8,128] store
    o_ref[...] = _dot(_bf(emb[0:DEC_ROWS, :]), dec_ref[...]) + b_dec


# ---------------- wrapper ----------------
def incontext_forward(x_snd, p):
    """x_snd: [S, N, dx+dy] (PyTorch seq-major layout).  Returns [N, DOUT]."""
    n = x_snd.shape[1]

    # raw tokens, padded: row 0 = zero placeholder for CLS, rows TOK.. are padding
    x = jnp.transpose(x_snd, (1, 0, 2)).astype(jnp.float32)          # [N, S, DIN]
    x = jnp.pad(x, ((0, 0), (1, T_PAD - 1 - SEQ), (0, 0)))           # [N, T_PAD, DIN]

    # ---- consolidated, pre-transposed bf16 weight slabs (q-scale folded) ----
    scale = jnp.float32(1.0 / np.sqrt(HEAD_DIM))
    w_qkv_t = jnp.transpose(p['w_qkv'], (0, 2, 1)).at[:, :, :DIM].multiply(scale)
    b_qkv = p['b_qkv'].at[:, :, :DIM].multiply(scale)
    w_out_t = jnp.transpose(p['w_out'], (0, 2, 1))
    w_ff1_t = jnp.transpose(p['w_ff1'], (0, 2, 1))
    w_slab = jnp.concatenate([w_qkv_t, w_out_t, w_ff1_t],
                             axis=-1).astype(jnp.bfloat16)           # [L, 32, 256]
    ff2_t = jnp.transpose(p['w_ff2'], (0, 2, 1)).astype(jnp.bfloat16)  # [L, 128, 32]
    dec_t = (jnp.zeros((DIM, DOUT_PAD), jnp.float32)
             .at[:, :DOUT].set(p['w_dec'].T)).astype(jnp.bfloat16)   # [32, 128]

    # ---- single f32 bias / LayerNorm / constants slab: [L+1, 8, 128] ----
    c = jnp.zeros((NUM_LAYERS + 1, 8, 128), jnp.float32)
    c = c.at[:NUM_LAYERS, 0, :3 * DIM].set(b_qkv[:, 0, :])
    c = c.at[:NUM_LAYERS, 1, :DIM].set(p['b_out'][:, 0, :])
    c = c.at[:NUM_LAYERS, 2, :DIM].set(p['ln1_g'][:, 0, :])
    c = c.at[:NUM_LAYERS, 3, :DIM].set(p['ln1_b'][:, 0, :])
    c = c.at[:NUM_LAYERS, 4, :4 * DIM].set(p['b_ff1'][:, 0, :])
    c = c.at[:NUM_LAYERS, 5, :DIM].set(p['b_ff2'][:, 0, :])
    c = c.at[:NUM_LAYERS, 6, :DIM].set(p['ln2_g'][:, 0, :])
    c = c.at[:NUM_LAYERS, 7, :DIM].set(p['ln2_b'][:, 0, :])
    c = c.at[NUM_LAYERS, 0, :DIM].set(p['cls'][0])
    c = c.at[NUM_LAYERS, 1, :DIM].set(p['b_enc'][0])
    c = c.at[NUM_LAYERS, 2:2 + DIN, :DIM].set(p['w_enc'].T)
    c = c.at[NUM_LAYERS, 4, :DOUT].set(p['b_dec'][0])

    out = pl.pallas_call(
        incontext_kernel,
        out_shape=jax.ShapeDtypeStruct((n * DEC_ROWS, DOUT_PAD), jnp.float32),
        grid_spec=pltpu.PrefetchScalarGridSpec(
            num_scalar_prefetch=0,
            grid=(n,),                                   # one example per step; grid >= 2 for N >= 2
            in_specs=[
                pl.BlockSpec((1, T_PAD, DIN), lambda i: (i, 0, 0)),
                pl.BlockSpec((NUM_LAYERS + 1, 8, 128), lambda i: (0, 0, 0)),   # consts (grid-invariant)
                pl.BlockSpec((NUM_LAYERS, DIM, 8 * DIM), lambda i: (0, 0, 0)),  # qkv|out|ff1 slab
                pl.BlockSpec((NUM_LAYERS, 4 * DIM, DIM), lambda i: (0, 0, 0)),  # ff2 slab
                pl.BlockSpec((DIM, DOUT_PAD), lambda i: (0, 0)),                # decoder slab
            ],
            out_specs=pl.BlockSpec((DEC_ROWS, DOUT_PAD), lambda i: (i, 0)),
            scratch_shapes=[pltpu.VMEM((T_PAD, DIM), jnp.float32)]),
        compiler_params=pltpu.CompilerParams(
            dimension_semantics=("parallel",)),
    )(x, c, w_slab, ff2_t, dec_t)

    # row 0 of each per-example [8,128] block is the CLS-token decoder output
    return out.reshape(n, DEC_ROWS, DOUT_PAD)[:, 0, :DOUT]           # [N, DOUT]


# ---------------- deterministic parameter init ----------------
def init_params(key):
    ks = list(jax.random.split(key, 20))

    def w(k, shape, scale=0.05):
        return (scale * jax.random.normal(k, shape)).astype(jnp.float32)

    return {
        'cls':   w(ks[0], (1, DIM), 0.1),                 # CLS parameter [1,1,dT] squeezed
        'w_enc': w(ks[1], (DIM, DIN)),
        'b_enc': jnp.zeros((1, DIM), jnp.float32),
        'w_qkv': w(ks[2], (NUM_LAYERS, 3 * DIM, DIM)),
        'b_qkv': w(ks[3], (NUM_LAYERS, 1, 3 * DIM), 0.01),
        'w_out': w(ks[4], (NUM_LAYERS, DIM, DIM)),
        'b_out': w(ks[5], (NUM_LAYERS, 1, DIM), 0.01),
        'ln1_g': jnp.ones((NUM_LAYERS, 1, DIM), jnp.float32),
        'ln1_b': jnp.zeros((NUM_LAYERS, 1, DIM), jnp.float32),
        'w_ff1': w(ks[6], (NUM_LAYERS, 4 * DIM, DIM)),
        'b_ff1': w(ks[7], (NUM_LAYERS, 1, 4 * DIM), 0.01),
        'w_ff2': w(ks[8], (NUM_LAYERS, DIM, 4 * DIM)),
        'b_ff2': w(ks[9], (NUM_LAYERS, 1, DIM), 0.01),
        'ln2_g': jnp.ones((NUM_LAYERS, 1, DIM), jnp.float32),
        'ln2_b': jnp.zeros((NUM_LAYERS, 1, DIM), jnp.float32),
        'w_dec': w(ks[10], (DOUT, DIM)),
        'b_dec': jnp.zeros((1, DOUT), jnp.float32),
    }


# ---------------- pure-JAX f32 reference (for correctness check) ----------------
def reference_forward(x_snd, p):
    x = jnp.transpose(x_snd, (1, 0, 2)).astype(jnp.float32)       # [N, S, DIN]
    outs = []
    scale = 1.0 / np.sqrt(HEAD_DIM)
    for b in range(x.shape[0]):
        xb = x[b]
        enc = xb @ p['w_enc'].T + p['b_enc']
        emb = jnp.concatenate([p['cls'], enc], axis=0)
        for l in range(NUM_LAYERS):
            qkv = emb @ p['w_qkv'][l].T + p['b_qkv'][l]
            q, k, v = qkv[:, :DIM], qkv[:, DIM:2 * DIM], qkv[:, 2 * DIM:]
            heads = []
            for h in range(NUM_HEADS):
                sl = slice(h * HEAD_DIM, (h + 1) * HEAD_DIM)
                s = (q[:, sl] * scale) @ k[:, sl].T
                a = jax.nn.softmax(s, axis=-1)
                heads.append(a @ v[:, sl])
            attn = jnp.concatenate(heads, axis=-1) @ p['w_out'][l].T + p['b_out'][l]
            src = _layernorm(emb + attn, p['ln1_g'][l], p['ln1_b'][l])
            ff = jnp.maximum(src @ p['w_ff1'][l].T + p['b_ff1'][l], 0.0)
            ff = ff @ p['w_ff2'][l].T + p['b_ff2'][l]
            emb = _layernorm(src + ff, p['ln2_g'][l], p['ln2_b'][l])
        outs.append(emb[0:1] @ p['w_dec'].T + p['b_dec'])
    return jnp.concatenate(outs, axis=0)


if __name__ == "__main__":
    key = jax.random.PRNGKey(0)
    k_x, k_p = jax.random.split(key)
    # InContextModel.forward receives x already transposed to [S, N, dx+dy]
    x = jax.random.normal(k_x, (SEQ, BATCH, DIN), dtype=jnp.float32)
    params = init_params(k_p)

    fwd = jax.jit(incontext_forward)
    out = jax.block_until_ready(fwd(x, params))

    ref = jax.block_until_ready(reference_forward(x, params))
    # bf16 MXU operands + approx softmax reciprocal: small documented deviation vs f32 ref
    np.testing.assert_allclose(np.asarray(out), np.asarray(ref), rtol=3e-2, atol=3e-2)
    assert out.shape == (BATCH, DOUT)
    print("KERNEL_OK")
</pallas_src>

<mosaic_0001>
module attributes {stable_mosaic.version = 11 : i64} {
  func.func @incontext_kernel(%arg0: i32, %arg1: memref<1x16x2xf32, #tpu.memory_space<vmem>>, %arg2: memref<3x8x128xf32, #tpu.memory_space<vmem>>, %arg3: memref<2x32x256xbf16, #tpu.memory_space<vmem>>, %arg4: memref<2x128x32xbf16, #tpu.memory_space<vmem>>, %arg5: memref<32x128xbf16, #tpu.memory_space<vmem>>, %arg6: memref<8x128xf32, #tpu.memory_space<vmem>>, %arg7: memref<16x32xf32, #tpu.memory_space<vmem>>) attributes {dimension_semantics = [#tpu.dimension_semantics<parallel>], iteration_bounds = array<i64: 2>, scalar_prefetch = 0 : i64, scratch_operands = 1 : i64, tpu.core_type = #tpu.core_type<tc>, window_params = [{transform_indices = @transform_0, window_bounds = array<i64: 1, 16, 2>}, {pipeline_mode = #tpu.pipeline_mode<synchronous>, transform_indices = @transform_1, window_bounds = array<i64: 3, 8, 128>}, {pipeline_mode = #tpu.pipeline_mode<synchronous>, transform_indices = @transform_2, window_bounds = array<i64: 2, 32, 256>}, {pipeline_mode = #tpu.pipeline_mode<synchronous>, transform_indices = @transform_3, window_bounds = array<i64: 2, 128, 32>}, {pipeline_mode = #tpu.pipeline_mode<synchronous>, transform_indices = @transform_4, window_bounds = array<i64: 32, 128>}, {transform_indices = @transform_5, window_bounds = array<i64: 8, 128>}]} {
    %c2 = arith.constant 2 : index
    %c0 = arith.constant 0 : index
    %c0_0 = arith.constant 0 : index
    %0 = vector.load %arg2[%c2, %c0, %c0_0] : memref<3x8x128xf32, #tpu.memory_space<vmem>>, vector<1x8x128xf32>
    %1 = vector.shape_cast %0 : vector<1x8x128xf32> to vector<8x128xf32>
    %2 = vector.extract_strided_slice %1 {offsets = [0, 0], sizes = [1, 32], strides = [1, 1]} : vector<8x128xf32> to vector<1x32xf32>
    %3 = vector.extract_strided_slice %1 {offsets = [1, 0], sizes = [1, 32], strides = [1, 1]} : vector<8x128xf32> to vector<1x32xf32>
    %4 = vector.extract_strided_slice %1 {offsets = [2, 0], sizes = [2, 32], strides = [1, 1]} : vector<8x128xf32> to vector<2x32xf32>
    %5 = vector.extract_strided_slice %1 {offsets = [4, 0], sizes = [1, 128], strides = [1, 1]} : vector<8x128xf32> to vector<1x128xf32>
    %c0_1 = arith.constant 0 : index
    %c0_2 = arith.constant 0 : index
    %c0_3 = arith.constant 0 : index
    %6 = vector.load %arg1[%c0_1, %c0_2, %c0_3] : memref<1x16x2xf32, #tpu.memory_space<vmem>>, vector<1x16x2xf32>
    %7 = vector.shape_cast %6 : vector<1x16x2xf32> to vector<16x2xf32>
    %8 = vector.extract_strided_slice %7 {offsets = [0, 0], sizes = [16, 1], strides = [1, 1]} : vector<16x2xf32> to vector<16x1xf32>
    %9 = vector.extract_strided_slice %4 {offsets = [0, 0], sizes = [1, 32], strides = [1, 1]} : vector<2x32xf32> to vector<1x32xf32>
    %10 = vector.broadcast %8 : vector<16x1xf32> to vector<16x32xf32>
    %11 = vector.broadcast %9 : vector<1x32xf32> to vector<16x32xf32>
    %12 = arith.mulf %10, %11 : vector<16x32xf32>
    %13 = vector.extract_strided_slice %7 {offsets = [0, 1], sizes = [16, 1], strides = [1, 1]} : vector<16x2xf32> to vector<16x1xf32>
    %14 = vector.extract_strided_slice %4 {offsets = [1, 0], sizes = [1, 32], strides = [1, 1]} : vector<2x32xf32> to vector<1x32xf32>
    %15 = vector.broadcast %13 : vector<16x1xf32> to vector<16x32xf32>
    %16 = vector.broadcast %14 : vector<1x32xf32> to vector<16x32xf32>
    %17 = arith.mulf %15, %16 : vector<16x32xf32>
    %18 = arith.addf %12, %17 : vector<16x32xf32>
    %19 = vector.broadcast %3 : vector<1x32xf32> to vector<16x32xf32>
    %20 = arith.addf %18, %19 : vector<16x32xf32>
    %21 = tpu.iota {dimensions = array<i32: 0>} : vector<16x1xi32>
    %c0_i32 = arith.constant 0 : i32
    %22 = vector.broadcast %c0_i32 : i32 to vector<16x1xi32>
    %23 = arith.cmpi eq, %21, %22 : vector<16x1xi32>
    %24 = vector.shape_cast %23 : vector<16x1xi1> to vector<16x1xi1>
    %25 = vector.broadcast %24 : vector<16x1xi1> to vector<16x32xi1>
    %26 = vector.shape_cast %2 : vector<1x32xf32> to vector<1x32xf32>
    %27 = vector.broadcast %26 : vector<1x32xf32> to vector<16x32xf32>
    %28 = arith.select %25, %27, %20 : vector<16x32xi1>, vector<16x32xf32>
    %29 = tpu.iota {dimensions = array<i32: 1>} : vector<1x16xi32>
    %c9_i32 = arith.constant 9 : i32
    %30 = vector.broadcast %c9_i32 : i32 to vector<1x16xi32>
    %31 = arith.cmpi slt, %29, %30 : vector<1x16xi32>
    %cst = arith.constant 0.000000e+00 : f32
    %cst_4 = arith.constant -1.000000e+30 : f32
    %32 = vector.broadcast %cst : f32 to vector<1x16xf32>
    %33 = vector.broadcast %cst_4 : f32 to vector<1x16xf32>
    %34 = arith.select %31, %32, %33 : vector<1x16xi1>, vector<1x16xf32>
    %c0_5 = arith.constant 0 : index
    %c0_6 = arith.constant 0 : index
    %c0_7 = arith.constant 0 : index
    %35 = vector.load %arg3[%c0_5, %c0_6, %c0_7] : memref<2x32x256xbf16, #tpu.memory_space<vmem>>, vector<1x32x256xbf16>
    %36 = vector.shape_cast %35 : vector<1x32x256xbf16> to vector<32x256xbf16>
    %c0_8 = arith.constant 0 : index
    %c0_9 = arith.constant 0 : index
    %c0_10 = arith.constant 0 : index
    %37 = vector.load %arg2[%c0_8, %c0_9, %c0_10] : memref<3x8x128xf32, #tpu.memory_space<vmem>>, vector<1x8x128xf32>
    %38 = vector.shape_cast %37 : vector<1x8x128xf32> to vector<8x128xf32>
    %39 = vector.extract_strided_slice %38 {offsets = [0, 0], sizes = [1, 96], strides = [1, 1]} : vector<8x128xf32> to vector<1x96xf32>
    %40 = vector.extract_strided_slice %38 {offsets = [1, 0], sizes = [1, 32], strides = [1, 1]} : vector<8x128xf32> to vector<1x32xf32>
    %41 = vector.extract_strided_slice %38 {offsets = [2, 0], sizes = [1, 32], strides = [1, 1]} : vector<8x128xf32> to vector<1x32xf32>
    %42 = vector.extract_strided_slice %38 {offsets = [3, 0], sizes = [1, 32], strides = [1, 1]} : vector<8x128xf32> to vector<1x32xf32>
    %43 = vector.extract_strided_slice %38 {offsets = [4, 0], sizes = [1, 128], strides = [1, 1]} : vector<8x128xf32> to vector<1x128xf32>
    %44 = vector.extract_strided_slice %38 {offsets = [5, 0], sizes = [1, 32], strides = [1, 1]} : vector<8x128xf32> to vector<1x32xf32>
    %45 = vector.extract_strided_slice %38 {offsets = [6, 0], sizes = [1, 32], strides = [1, 1]} : vector<8x128xf32> to vector<1x32xf32>
    %46 = vector.extract_strided_slice %38 {offsets = [7, 0], sizes = [1, 32], strides = [1, 1]} : vector<8x128xf32> to vector<1x32xf32>
    %47 = arith.truncf %28 : vector<16x32xf32> to vector<16x32xbf16>
    %48 = vector.extract_strided_slice %36 {offsets = [0, 0], sizes = [32, 96], strides = [1, 1]} : vector<32x256xbf16> to vector<32x96xbf16>
    %cst_11 = arith.constant dense<0.000000e+00> : vector<16x96xf32>
    %49 = tpu.matmul %47, %48, %cst_11 {dimension_numbers = #tpu.dot_dimension_numbers<[1], [0], [0], [1], [0, 0, 1, 1], [], []>} : vector<16x32xbf16>, vector<32x96xbf16>, vector<16x96xf32> -> vector<16x96xf32>
    %50 = vector.broadcast %39 : vector<1x96xf32> to vector<16x96xf32>
    %51 = arith.addf %49, %50 : vector<16x96xf32>
    %52 = vector.extract_strided_slice %51 {offsets = [0, 0], sizes = [16, 32], strides = [1, 1]} : vector<16x96xf32> to vector<16x32xf32>
    %53 = arith.truncf %52 : vector<16x32xf32> to vector<16x32xbf16>
    %54 = vector.extract_strided_slice %51 {offsets = [0, 32], sizes = [16, 32], strides = [1, 1]} : vector<16x96xf32> to vector<16x32xf32>
    %55 = vector.extract_strided_slice %51 {offsets = [0, 64], sizes = [16, 32], strides = [1, 1]} : vector<16x96xf32> to vector<16x32xf32>
    %56 = arith.truncf %55 : vector<16x32xf32> to vector<16x32xbf16>
    %57 = tpu.transpose %54, [1, 0] : vector<16x32xf32> -> vector<32x16xf32>
    %58 = arith.truncf %57 : vector<32x16xf32> to vector<32x16xbf16>
    %59 = vector.extract_strided_slice %53 {offsets = [0, 0], sizes = [16, 8], strides = [1, 1]} : vector<16x32xbf16> to vector<16x8xbf16>
    %60 = vector.extract_strided_slice %58 {offsets = [0, 0], sizes = [8, 16], strides = [1, 1]} : vector<32x16xbf16> to vector<8x16xbf16>
    %cst_12 = arith.constant dense<0.000000e+00> : vector<16x16xf32>
    %61 = tpu.matmul %59, %60, %cst_12 {dimension_numbers = #tpu.dot_dimension_numbers<[1], [0], [0], [1], [0, 0, 1, 1], [], []>} : vector<16x8xbf16>, vector<8x16xbf16>, vector<16x16xf32> -> vector<16x16xf32>
    %62 = vector.broadcast %34 : vector<1x16xf32> to vector<16x16xf32>
    %63 = arith.addf %61, %62 : vector<16x16xf32>
    %cst_13 = arith.constant dense<0xFF800000> : vector<16xf32>
    %64 = vector.multi_reduction <maximumf>, %63, %cst_13 [1] : vector<16x16xf32> to vector<16xf32>
    %65 = vector.shape_cast %64 : vector<16xf32> to vector<16x1xf32>
    %66 = vector.broadcast %65 : vector<16x1xf32> to vector<16x16xf32>
    %67 = arith.subf %63, %66 : vector<16x16xf32>
    %68 = math.exp %67 : vector<16x16xf32>
    %cst_14 = arith.constant dense<0.000000e+00> : vector<16xf32>
    %69 = vector.multi_reduction <add>, %68, %cst_14 [1] : vector<16x16xf32> to vector<16xf32>
    %70 = vector.shape_cast %69 : vector<16xf32> to vector<16x1xf32>
    %71 = tpu.reciprocal %70 {approx = true} : vector<16x1xf32> -> vector<16x1xf32>
    %72 = vector.broadcast %71 : vector<16x1xf32> to vector<16x16xf32>
    %73 = arith.mulf %68, %72 : vector<16x16xf32>
    %74 = arith.truncf %73 : vector<16x16xf32> to vector<16x16xbf16>
    %75 = vector.extract_strided_slice %56 {offsets = [0, 0], sizes = [16, 8], strides = [1, 1]} : vector<16x32xbf16> to vector<16x8xbf16>
    %cst_15 = arith.constant dense<0.000000e+00> : vector<16x8xf32>
    %76 = tpu.matmul %74, %75, %cst_15 {dimension_numbers = #tpu.dot_dimension_numbers<[1], [0], [0], [1], [0, 0, 1, 1], [], []>} : vector<16x16xbf16>, vector<16x8xbf16>, vector<16x8xf32> -> vector<16x8xf32>
    %c0_16 = arith.constant 0 : index
    %c0_17 = arith.constant 0 : index
    %77 = vector.load %arg7[%c0_16, %c0_17] : memref<16x32xf32, #tpu.memory_space<vmem>>, vector<16x8xf32>
    tpu.vector_store %arg7[%c0_16, %c0_17], %76 {strides = array<i32>} : memref<16x32xf32, #tpu.memory_space<vmem>>, vector<16x8xf32>,
    %78 = vector.extract_strided_slice %53 {offsets = [0, 8], sizes = [16, 8], strides = [1, 1]} : vector<16x32xbf16> to vector<16x8xbf16>
    %79 = vector.extract_strided_slice %58 {offsets = [8, 0], sizes = [8, 16], strides = [1, 1]} : vector<32x16xbf16> to vector<8x16xbf16>
    %cst_18 = arith.constant dense<0.000000e+00> : vector<16x16xf32>
    %80 = tpu.matmul %78, %79, %cst_18 {dimension_numbers = #tpu.dot_dimension_numbers<[1], [0], [0], [1], [0, 0, 1, 1], [], []>} : vector<16x8xbf16>, vector<8x16xbf16>, vector<16x16xf32> -> vector<16x16xf32>
    %81 = vector.broadcast %34 : vector<1x16xf32> to vector<16x16xf32>
    %82 = arith.addf %80, %81 : vector<16x16xf32>
    %cst_19 = arith.constant dense<0xFF800000> : vector<16xf32>
    %83 = vector.multi_reduction <maximumf>, %82, %cst_19 [1] : vector<16x16xf32> to vector<16xf32>
    %84 = vector.shape_cast %83 : vector<16xf32> to vector<16x1xf32>
    %85 = vector.broadcast %84 : vector<16x1xf32> to vector<16x16xf32>
    %86 = arith.subf %82, %85 : vector<16x16xf32>
    %87 = math.exp %86 : vector<16x16xf32>
    %cst_20 = arith.constant dense<0.000000e+00> : vector<16xf32>
    %88 = vector.multi_reduction <add>, %87, %cst_20 [1] : vector<16x16xf32> to vector<16xf32>
    %89 = vector.shape_cast %88 : vector<16xf32> to vector<16x1xf32>
    %90 = tpu.reciprocal %89 {approx = true} : vector<16x1xf32> -> vector<16x1xf32>
    %91 = vector.broadcast %90 : vector<16x1xf32> to vector<16x16xf32>
    %92 = arith.mulf %87, %91 : vector<16x16xf32>
    %93 = arith.truncf %92 : vector<16x16xf32> to vector<16x16xbf16>
    %94 = vector.extract_strided_slice %56 {offsets = [0, 8], sizes = [16, 8], strides = [1, 1]} : vector<16x32xbf16> to vector<16x8xbf16>
    %cst_21 = arith.constant dense<0.000000e+00> : vector<16x8xf32>
    %95 = tpu.matmul %93, %94, %cst_21 {dimension_numbers = #tpu.dot_dimension_numbers<[1], [0], [0], [1], [0, 0, 1, 1], [], []>} : vector<16x16xbf16>, vector<16x8xbf16>, vector<16x8xf32> -> vector<16x8xf32>
    %c0_22 = arith.constant 0 : index
    %c8 = arith.constant 8 : index
    %96 = vector.load %arg7[%c0_22, %c8] : memref<16x32xf32, #tpu.memory_space<vmem>>, vector<16x8xf32>
    tpu.vector_store %arg7[%c0_22, %c8], %95 {strides = array<i32>} : memref<16x32xf32, #tpu.memory_space<vmem>>, vector<16x8xf32>,
    %97 = vector.extract_strided_slice %53 {offsets = [0, 16], sizes = [16, 8], strides = [1, 1]} : vector<16x32xbf16> to vector<16x8xbf16>
    %98 = vector.extract_strided_slice %58 {offsets = [16, 0], sizes = [8, 16], strides = [1, 1]} : vector<32x16xbf16> to vector<8x16xbf16>
    %cst_23 = arith.constant dense<0.000000e+00> : vector<16x16xf32>
    %99 = tpu.matmul %97, %98, %cst_23 {dimension_numbers = #tpu.dot_dimension_numbers<[1], [0], [0], [1], [0, 0, 1, 1], [], []>} : vector<16x8xbf16>, vector<8x16xbf16>, vector<16x16xf32> -> vector<16x16xf32>
    %100 = vector.broadcast %34 : vector<1x16xf32> to vector<16x16xf32>
    %101 = arith.addf %99, %100 : vector<16x16xf32>
    %cst_24 = arith.constant dense<0xFF800000> : vector<16xf32>
    %102 = vector.multi_reduction <maximumf>, %101, %cst_24 [1] : vector<16x16xf32> to vector<16xf32>
    %103 = vector.shape_cast %102 : vector<16xf32> to vector<16x1xf32>
    %104 = vector.broadcast %103 : vector<16x1xf32> to vector<16x16xf32>
    %105 = arith.subf %101, %104 : vector<16x16xf32>
    %106 = math.exp %105 : vector<16x16xf32>
    %cst_25 = arith.constant dense<0.000000e+00> : vector<16xf32>
    %107 = vector.multi_reduction <add>, %106, %cst_25 [1] : vector<16x16xf32> to vector<16xf32>
    %108 = vector.shape_cast %107 : vector<16xf32> to vector<16x1xf32>
    %109 = tpu.reciprocal %108 {approx = true} : vector<16x1xf32> -> vector<16x1xf32>
    %110 = vector.broadcast %109 : vector<16x1xf32> to vector<16x16xf32>
    %111 = arith.mulf %106, %110 : vector<16x16xf32>
    %112 = arith.truncf %111 : vector<16x16xf32> to vector<16x16xbf16>
    %113 = vector.extract_strided_slice %56 {offsets = [0, 16], sizes = [16, 8], strides = [1, 1]} : vector<16x32xbf16> to vector<16x8xbf16>
    %cst_26 = arith.constant dense<0.000000e+00> : vector<16x8xf32>
    %114 = tpu.matmul %112, %113, %cst_26 {dimension_numbers = #tpu.dot_dimension_numbers<[1], [0], [0], [1], [0, 0, 1, 1], [], []>} : vector<16x16xbf16>, vector<16x8xbf16>, vector<16x8xf32> -> vector<16x8xf32>
    %c0_27 = arith.constant 0 : index
    %c16 = arith.constant 16 : index
    %115 = vector.load %arg7[%c0_27, %c16] : memref<16x32xf32, #tpu.memory_space<vmem>>, vector<16x8xf32>
    tpu.vector_store %arg7[%c0_27, %c16], %114 {strides = array<i32>} : memref<16x32xf32, #tpu.memory_space<vmem>>, vector<16x8xf32>,
    %116 = vector.extract_strided_slice %53 {offsets = [0, 24], sizes = [16, 8], strides = [1, 1]} : vector<16x32xbf16> to vector<16x8xbf16>
    %117 = vector.extract_strided_slice %58 {offsets = [24, 0], sizes = [8, 16], strides = [1, 1]} : vector<32x16xbf16> to vector<8x16xbf16>
    %cst_28 = arith.constant dense<0.000000e+00> : vector<16x16xf32>
    %118 = tpu.matmul %116, %117, %cst_28 {dimension_numbers = #tpu.dot_dimension_numbers<[1], [0], [0], [1], [0, 0, 1, 1], [], []>} : vector<16x8xbf16>, vector<8x16xbf16>, vector<16x16xf32> -> vector<16x16xf32>
    %119 = vector.broadcast %34 : vector<1x16xf32> to vector<16x16xf32>
    %120 = arith.addf %118, %119 : vector<16x16xf32>
    %cst_29 = arith.constant dense<0xFF800000> : vector<16xf32>
    %121 = vector.multi_reduction <maximumf>, %120, %cst_29 [1] : vector<16x16xf32> to vector<16xf32>
    %122 = vector.shape_cast %121 : vector<16xf32> to vector<16x1xf32>
    %123 = vector.broadcast %122 : vector<16x1xf32> to vector<16x16xf32>
    %124 = arith.subf %120, %123 : vector<16x16xf32>
    %125 = math.exp %124 : vector<16x16xf32>
    %cst_30 = arith.constant dense<0.000000e+00> : vector<16xf32>
    %126 = vector.multi_reduction <add>, %125, %cst_30 [1] : vector<16x16xf32> to vector<16xf32>
    %127 = vector.shape_cast %126 : vector<16xf32> to vector<16x1xf32>
    %128 = tpu.reciprocal %127 {approx = true} : vector<16x1xf32> -> vector<16x1xf32>
    %129 = vector.broadcast %128 : vector<16x1xf32> to vector<16x16xf32>
    %130 = arith.mulf %125, %129 : vector<16x16xf32>
    %131 = arith.truncf %130 : vector<16x16xf32> to vector<16x16xbf16>
    %132 = vector.extract_strided_slice %56 {offsets = [0, 24], sizes = [16, 8], strides = [1, 1]} : vector<16x32xbf16> to vector<16x8xbf16>
    %cst_31 = arith.constant dense<0.000000e+00> : vector<16x8xf32>
    %133 = tpu.matmul %131, %132, %cst_31 {dimension_numbers = #tpu.dot_dimension_numbers<[1], [0], [0], [1], [0, 0, 1, 1], [], []>} : vector<16x16xbf16>, vector<16x8xbf16>, vector<16x8xf32> -> vector<16x8xf32>
    %c0_32 = arith.constant 0 : index
    %c24 = arith.constant 24 : index
    %134 = vector.load %arg7[%c0_32, %c24] : memref<16x32xf32, #tpu.memory_space<vmem>>, vector<16x8xf32>
    tpu.vector_store %arg7[%c0_32, %c24], %133 {strides = array<i32>} : memref<16x32xf32, #tpu.memory_space<vmem>>, vector<16x8xf32>,
    %c0_33 = arith.constant 0 : index
    %c0_34 = arith.constant 0 : index
    %135 = vector.load %arg7[%c0_33, %c0_34] : memref<16x32xf32, #tpu.memory_space<vmem>>, vector<16x32xf32>
    %136 = arith.truncf %135 : vector<16x32xf32> to vector<16x32xbf16>
    %137 = vector.extract_strided_slice %36 {offsets = [0, 96], sizes = [32, 32], strides = [1, 1]} : vector<32x256xbf16> to vector<32x32xbf16>
    %cst_35 = arith.constant dense<0.000000e+00> : vector<16x32xf32>
    %138 = tpu.matmul %136, %137, %cst_35 {dimension_numbers = #tpu.dot_dimension_numbers<[1], [0], [0], [1], [0, 0, 1, 1], [], []>} : vector<16x32xbf16>, vector<32x32xbf16>, vector<16x32xf32> -> vector<16x32xf32>
    %139 = vector.broadcast %40 : vector<1x32xf32> to vector<16x32xf32>
    %140 = arith.addf %138, %139 : vector<16x32xf32>
    %141 = arith.addf %28, %140 : vector<16x32xf32>
    %cst_36 = arith.constant dense<0.000000e+00> : vector<16xf32>
    %142 = vector.multi_reduction <add>, %141, %cst_36 [1] : vector<16x32xf32> to vector<16xf32>
    %143 = vector.shape_cast %142 : vector<16xf32> to vector<16x1xf32>
    %cst_37 = arith.constant 3.200000e+01 : f32
    %144 = vector.broadcast %cst_37 : f32 to vector<16x1xf32>
    %145 = arith.divf %143, %144 : vector<16x1xf32>
    %146 = vector.broadcast %145 : vector<16x1xf32> to vector<16x32xf32>
    %147 = arith.subf %141, %146 : vector<16x32xf32>
    %148 = arith.mulf %147, %147 : vector<16x32xf32>
    %cst_38 = arith.constant dense<0.000000e+00> : vector<16xf32>
    %149 = vector.multi_reduction <add>, %148, %cst_38 [1] : vector<16x32xf32> to vector<16xf32>
    %150 = vector.shape_cast %149 : vector<16xf32> to vector<16x1xf32>
    %cst_39 = arith.constant 3.200000e+01 : f32
    %151 = vector.broadcast %cst_39 : f32 to vector<16x1xf32>
    %152 = arith.divf %150, %151 : vector<16x1xf32>
    %153 = vector.broadcast %145 : vector<16x1xf32> to vector<16x32xf32>
    %154 = arith.subf %141, %153 : vector<16x32xf32>
    %cst_40 = arith.constant 9.99999974E-6 : f32
    %155 = vector.broadcast %cst_40 : f32 to vector<16x1xf32>
    %156 = arith.addf %152, %155 : vector<16x1xf32>
    %157 = math.rsqrt %156 : vector<16x1xf32>
    %158 = vector.broadcast %157 : vector<16x1xf32> to vector<16x32xf32>
    %159 = arith.mulf %154, %158 : vector<16x32xf32>
    %160 = vector.broadcast %41 : vector<1x32xf32> to vector<16x32xf32>
    %161 = arith.mulf %159, %160 : vector<16x32xf32>
    %162 = vector.broadcast %42 : vector<1x32xf32> to vector<16x32xf32>
    %163 = arith.addf %161, %162 : vector<16x32xf32>
    %164 = arith.truncf %163 : vector<16x32xf32> to vector<16x32xbf16>
    %165 = vector.extract_strided_slice %36 {offsets = [0, 128], sizes = [32, 128], strides = [1, 1]} : vector<32x256xbf16> to vector<32x128xbf16>
    %cst_41 = arith.constant dense<0.000000e+00> : vector<16x128xf32>
    %166 = tpu.matmul %164, %165, %cst_41 {dimension_numbers = #tpu.dot_dimension_numbers<[1], [0], [0], [1], [0, 0, 1, 1], [], []>} : vector<16x32xbf16>, vector<32x128xbf16>, vector<16x128xf32> -> vector<16x128xf32>
    %167 = vector.broadcast %43 : vector<1x128xf32> to vector<16x128xf32>
    %168 = arith.addf %166, %167 : vector<16x128xf32>
    %cst_42 = arith.constant 0.000000e+00 : f32
    %169 = vector.broadcast %cst_42 : f32 to vector<16x128xf32>
    %170 = arith.maximumf %168, %169 : vector<16x128xf32>
    %171 = arith.truncf %170 : vector<16x128xf32> to vector<16x128xbf16>
    %c0_43 = arith.constant 0 : index
    %c0_44 = arith.constant 0 : index
    %c0_45 = arith.constant 0 : index
    %172 = vector.load %arg4[%c0_43, %c0_44, %c0_45] : memref<2x128x32xbf16, #tpu.memory_space<vmem>>, vector<1x128x32xbf16>
    %173 = vector.shape_cast %172 : vector<1x128x32xbf16> to vector<128x32xbf16>
    %cst_46 = arith.constant dense<0.000000e+00> : vector<16x32xf32>
    %174 = tpu.matmul %171, %173, %cst_46 {dimension_numbers = #tpu.dot_dimension_numbers<[1], [0], [0], [1], [0, 0, 1, 1], [], []>} : vector<16x128xbf16>, vector<128x32xbf16>, vector<16x32xf32> -> vector<16x32xf32>
    %175 = vector.broadcast %44 : vector<1x32xf32> to vector<16x32xf32>
    %176 = arith.addf %174, %175 : vector<16x32xf32>
    %177 = arith.addf %163, %176 : vector<16x32xf32>
    %cst_47 = arith.constant dense<0.000000e+00> : vector<16xf32>
    %178 = vector.multi_reduction <add>, %177, %cst_47 [1] : vector<16x32xf32> to vector<16xf32>
    %179 = vector.shape_cast %178 : vector<16xf32> to vector<16x1xf32>
    %cst_48 = arith.constant 3.200000e+01 : f32
    %180 = vector.broadcast %cst_48 : f32 to vector<16x1xf32>
    %181 = arith.divf %179, %180 : vector<16x1xf32>
    %182 = vector.broadcast %181 : vector<16x1xf32> to vector<16x32xf32>
    %183 = arith.subf %177, %182 : vector<16x32xf32>
    %184 = arith.mulf %183, %183 : vector<16x32xf32>
    %cst_49 = arith.constant dense<0.000000e+00> : vector<16xf32>
    %185 = vector.multi_reduction <add>, %184, %cst_49 [1] : vector<16x32xf32> to vector<16xf32>
    %186 = vector.shape_cast %185 : vector<16xf32> to vector<16x1xf32>
    %cst_50 = arith.constant 3.200000e+01 : f32
    %187 = vector.broadcast %cst_50 : f32 to vector<16x1xf32>
    %188 = arith.divf %186, %187 : vector<16x1xf32>
    %189 = vector.broadcast %181 : vector<16x1xf32> to vector<16x32xf32>
    %190 = arith.subf %177, %189 : vector<16x32xf32>
    %cst_51 = arith.constant 9.99999974E-6 : f32
    %191 = vector.broadcast %cst_51 : f32 to vector<16x1xf32>
    %192 = arith.addf %188, %191 : vector<16x1xf32>
    %193 = math.rsqrt %192 : vector<16x1xf32>
    %194 = vector.broadcast %193 : vector<16x1xf32> to vector<16x32xf32>
    %195 = arith.mulf %190, %194 : vector<16x32xf32>
    %196 = vector.broadcast %45 : vector<1x32xf32> to vector<16x32xf32>
    %197 = arith.mulf %195, %196 : vector<16x32xf32>
    %198 = vector.broadcast %46 : vector<1x32xf32> to vector<16x32xf32>
    %199 = arith.addf %197, %198 : vector<16x32xf32>
    %c1 = arith.constant 1 : index
    %c0_52 = arith.constant 0 : index
    %c0_53 = arith.constant 0 : index
    %200 = vector.load %arg3[%c1, %c0_52, %c0_53] : memref<2x32x256xbf16, #tpu.memory_space<vmem>>, vector<1x32x256xbf16>
    %201 = vector.shape_cast %200 : vector<1x32x256xbf16> to vector<32x256xbf16>
    %c1_54 = arith.constant 1 : index
    %c0_55 = arith.constant 0 : index
    %c0_56 = arith.constant 0 : index
    %202 = vector.load %arg2[%c1_54, %c0_55, %c0_56] : memref<3x8x128xf32, #tpu.memory_space<vmem>>, vector<1x8x128xf32>
    %203 = vector.shape_cast %202 : vector<1x8x128xf32> to vector<8x128xf32>
    %204 = vector.extract_strided_slice %203 {offsets = [0, 0], sizes = [1, 96], strides = [1, 1]} : vector<8x128xf32> to vector<1x96xf32>
    %205 = vector.extract_strided_slice %203 {offsets = [1, 0], sizes = [1, 32], strides = [1, 1]} : vector<8x128xf32> to vector<1x32xf32>
    %206 = vector.extract_strided_slice %203 {offsets = [2, 0], sizes = [1, 32], strides = [1, 1]} : vector<8x128xf32> to vector<1x32xf32>
    %207 = vector.extract_strided_slice %203 {offsets = [3, 0], sizes = [1, 32], strides = [1, 1]} : vector<8x128xf32> to vector<1x32xf32>
    %208 = vector.extract_strided_slice %203 {offsets = [4, 0], sizes = [1, 128], strides = [1, 1]} : vector<8x128xf32> to vector<1x128xf32>
    %209 = vector.extract_strided_slice %203 {offsets = [5, 0], sizes = [1, 32], strides = [1, 1]} : vector<8x128xf32> to vector<1x32xf32>
    %210 = vector.extract_strided_slice %203 {offsets = [6, 0], sizes = [1, 32], strides = [1, 1]} : vector<8x128xf32> to vector<1x32xf32>
    %211 = vector.extract_strided_slice %203 {offsets = [7, 0], sizes = [1, 32], strides = [1, 1]} : vector<8x128xf32> to vector<1x32xf32>
    %212 = arith.truncf %199 : vector<16x32xf32> to vector<16x32xbf16>
    %213 = vector.extract_strided_slice %201 {offsets = [0, 0], sizes = [32, 96], strides = [1, 1]} : vector<32x256xbf16> to vector<32x96xbf16>
    %cst_57 = arith.constant dense<0.000000e+00> : vector<16x96xf32>
    %214 = tpu.matmul %212, %213, %cst_57 {dimension_numbers = #tpu.dot_dimension_numbers<[1], [0], [0], [1], [0, 0, 1, 1], [], []>} : vector<16x32xbf16>, vector<32x96xbf16>, vector<16x96xf32> -> vector<16x96xf32>
    %215 = vector.broadcast %204 : vector<1x96xf32> to vector<16x96xf32>
    %216 = arith.addf %214, %215 : vector<16x96xf32>
    %217 = vector.extract_strided_slice %216 {offsets = [0, 0], sizes = [16, 32], strides = [1, 1]} : vector<16x96xf32> to vector<16x32xf32>
    %218 = arith.truncf %217 : vector<16x32xf32> to vector<16x32xbf16>
    %219 = vector.extract_strided_slice %216 {offsets = [0, 32], sizes = [16, 32], strides = [1, 1]} : vector<16x96xf32> to vector<16x32xf32>
    %220 = vector.extract_strided_slice %216 {offsets = [0, 64], sizes = [16, 32], strides = [1, 1]} : vector<16x96xf32> to vector<16x32xf32>
    %221 = arith.truncf %220 : vector<16x32xf32> to vector<16x32xbf16>
    %222 = tpu.transpose %219, [1, 0] : vector<16x32xf32> -> vector<32x16xf32>
    %223 = arith.truncf %222 : vector<32x16xf32> to vector<32x16xbf16>
    %224 = vector.extract_strided_slice %218 {offsets = [0, 0], sizes = [16, 8], strides = [1, 1]} : vector<16x32xbf16> to vector<16x8xbf16>
    %225 = vector.extract_strided_slice %223 {offsets = [0, 0], sizes = [8, 16], strides = [1, 1]} : vector<32x16xbf16> to vector<8x16xbf16>
    %cst_58 = arith.constant dense<0.000000e+00> : vector<16x16xf32>
    %226 = tpu.matmul %224, %225, %cst_58 {dimension_numbers = #tpu.dot_dimension_numbers<[1], [0], [0], [1], [0, 0, 1, 1], [], []>} : vector<16x8xbf16>, vector<8x16xbf16>, vector<16x16xf32> -> vector<16x16xf32>
    %227 = vector.broadcast %34 : vector<1x16xf32> to vector<16x16xf32>
    %228 = arith.addf %226, %227 : vector<16x16xf32>
    %cst_59 = arith.constant dense<0xFF800000> : vector<16xf32>
    %229 = vector.multi_reduction <maximumf>, %228, %cst_59 [1] : vector<16x16xf32> to vector<16xf32>
    %230 = vector.shape_cast %229 : vector<16xf32> to vector<16x1xf32>
    %231 = vector.broadcast %230 : vector<16x1xf32> to vector<16x16xf32>
    %232 = arith.subf %228, %231 : vector<16x16xf32>
    %233 = math.exp %232 : vector<16x16xf32>
    %cst_60 = arith.constant dense<0.000000e+00> : vector<16xf32>
    %234 = vector.multi_reduction <add>, %233, %cst_60 [1] : vector<16x16xf32> to vector<16xf32>
    %235 = vector.shape_cast %234 : vector<16xf32> to vector<16x1xf32>
    %236 = tpu.reciprocal %235 {approx = true} : vector<16x1xf32> -> vector<16x1xf32>
    %237 = vector.broadcast %236 : vector<16x1xf32> to vector<16x16xf32>
    %238 = arith.mulf %233, %237 : vector<16x16xf32>
    %239 = arith.truncf %238 : vector<16x16xf32> to vector<16x16xbf16>
    %240 = vector.extract_strided_slice %221 {offsets = [0, 0], sizes = [16, 8], strides = [1, 1]} : vector<16x32xbf16> to vector<16x8xbf16>
    %cst_61 = arith.constant dense<0.000000e+00> : vector<16x8xf32>
    %241 = tpu.matmul %239, %240, %cst_61 {dimension_numbers = #tpu.dot_dimension_numbers<[1], [0], [0], [1], [0, 0, 1, 1], [], []>} : vector<16x16xbf16>, vector<16x8xbf16>, vector<16x8xf32> -> vector<16x8xf32>
    %c0_62 = arith.constant 0 : index
    %c0_63 = arith.constant 0 : index
    %242 = vector.load %arg7[%c0_62, %c0_63] : memref<16x32xf32, #tpu.memory_space<vmem>>, vector<16x8xf32>
    tpu.vector_store %arg7[%c0_62, %c0_63], %241 {strides = array<i32>} : memref<16x32xf32, #tpu.memory_space<vmem>>, vector<16x8xf32>,
    %243 = vector.extract_strided_slice %218 {offsets = [0, 8], sizes = [16, 8], strides = [1, 1]} : vector<16x32xbf16> to vector<16x8xbf16>
    %244 = vector.extract_strided_slice %223 {offsets = [8, 0], sizes = [8, 16], strides = [1, 1]} : vector<32x16xbf16> to vector<8x16xbf16>
    %cst_64 = arith.constant dense<0.000000e+00> : vector<16x16xf32>
    %245 = tpu.matmul %243, %244, %cst_64 {dimension_numbers = #tpu.dot_dimension_numbers<[1], [0], [0], [1], [0, 0, 1, 1], [], []>} : vector<16x8xbf16>, vector<8x16xbf16>, vector<16x16xf32> -> vector<16x16xf32>
    %246 = vector.broadcast %34 : vector<1x16xf32> to vector<16x16xf32>
    %247 = arith.addf %245, %246 : vector<16x16xf32>
    %cst_65 = arith.constant dense<0xFF800000> : vector<16xf32>
    %248 = vector.multi_reduction <maximumf>, %247, %cst_65 [1] : vector<16x16xf32> to vector<16xf32>
    %249 = vector.shape_cast %248 : vector<16xf32> to vector<16x1xf32>
    %250 = vector.broadcast %249 : vector<16x1xf32> to vector<16x16xf32>
    %251 = arith.subf %247, %250 : vector<16x16xf32>
    %252 = math.exp %251 : vector<16x16xf32>
    %cst_66 = arith.constant dense<0.000000e+00> : vector<16xf32>
    %253 = vector.multi_reduction <add>, %252, %cst_66 [1] : vector<16x16xf32> to vector<16xf32>
    %254 = vector.shape_cast %253 : vector<16xf32> to vector<16x1xf32>
    %255 = tpu.reciprocal %254 {approx = true} : vector<16x1xf32> -> vector<16x1xf32>
    %256 = vector.broadcast %255 : vector<16x1xf32> to vector<16x16xf32>
    %257 = arith.mulf %252, %256 : vector<16x16xf32>
    %258 = arith.truncf %257 : vector<16x16xf32> to vector<16x16xbf16>
    %259 = vector.extract_strided_slice %221 {offsets = [0, 8], sizes = [16, 8], strides = [1, 1]} : vector<16x32xbf16> to vector<16x8xbf16>
    %cst_67 = arith.constant dense<0.000000e+00> : vector<16x8xf32>
    %260 = tpu.matmul %258, %259, %cst_67 {dimension_numbers = #tpu.dot_dimension_numbers<[1], [0], [0], [1], [0, 0, 1, 1], [], []>} : vector<16x16xbf16>, vector<16x8xbf16>, vector<16x8xf32> -> vector<16x8xf32>
    %c0_68 = arith.constant 0 : index
    %c8_69 = arith.constant 8 : index
    %261 = vector.load %arg7[%c0_68, %c8_69] : memref<16x32xf32, #tpu.memory_space<vmem>>, vector<16x8xf32>
    tpu.vector_store %arg7[%c0_68, %c8_69], %260 {strides = array<i32>} : memref<16x32xf32, #tpu.memory_space<vmem>>, vector<16x8xf32>,
    %262 = vector.extract_strided_slice %218 {offsets = [0, 16], sizes = [16, 8], strides = [1, 1]} : vector<16x32xbf16> to vector<16x8xbf16>
    %263 = vector.extract_strided_slice %223 {offsets = [16, 0], sizes = [8, 16], strides = [1, 1]} : vector<32x16xbf16> to vector<8x16xbf16>
    %cst_70 = arith.constant dense<0.000000e+00> : vector<16x16xf32>
    %264 = tpu.matmul %262, %263, %cst_70 {dimension_numbers = #tpu.dot_dimension_numbers<[1], [0], [0], [1], [0, 0, 1, 1], [], []>} : vector<16x8xbf16>, vector<8x16xbf16>, vector<16x16xf32> -> vector<16x16xf32>
    %265 = vector.broadcast %34 : vector<1x16xf32> to vector<16x16xf32>
    %266 = arith.addf %264, %265 : vector<16x16xf32>
    %cst_71 = arith.constant dense<0xFF800000> : vector<16xf32>
    %267 = vector.multi_reduction <maximumf>, %266, %cst_71 [1] : vector<16x16xf32> to vector<16xf32>
    %268 = vector.shape_cast %267 : vector<16xf32> to vector<16x1xf32>
    %269 = vector.broadcast %268 : vector<16x1xf32> to vector<16x16xf32>
    %270 = arith.subf %266, %269 : vector<16x16xf32>
    %271 = math.exp %270 : vector<16x16xf32>
    %cst_72 = arith.constant dense<0.000000e+00> : vector<16xf32>
    %272 = vector.multi_reduction <add>, %271, %cst_72 [1] : vector<16x16xf32> to vector<16xf32>
    %273 = vector.shape_cast %272 : vector<16xf32> to vector<16x1xf32>
    %274 = tpu.reciprocal %273 {approx = true} : vector<16x1xf32> -> vector<16x1xf32>
    %275 = vector.broadcast %274 : vector<16x1xf32> to vector<16x16xf32>
    %276 = arith.mulf %271, %275 : vector<16x16xf32>
    %277 = arith.truncf %276 : vector<16x16xf32> to vector<16x16xbf16>
    %278 = vector.extract_strided_slice %221 {offsets = [0, 16], sizes = [16, 8], strides = [1, 1]} : vector<16x32xbf16> to vector<16x8xbf16>
    %cst_73 = arith.constant dense<0.000000e+00> : vector<16x8xf32>
    %279 = tpu.matmul %277, %278, %cst_73 {dimension_numbers = #tpu.dot_dimension_numbers<[1], [0], [0], [1], [0, 0, 1, 1], [], []>} : vector<16x16xbf16>, vector<16x8xbf16>, vector<16x8xf32> -> vector<16x8xf32>
    %c0_74 = arith.constant 0 : index
    %c16_75 = arith.constant 16 : index
    %280 = vector.load %arg7[%c0_74, %c16_75] : memref<16x32xf32, #tpu.memory_space<vmem>>, vector<16x8xf32>
    tpu.vector_store %arg7[%c0_74, %c16_75], %279 {strides = array<i32>} : memref<16x32xf32, #tpu.memory_space<vmem>>, vector<16x8xf32>,
    %281 = vector.extract_strided_slice %218 {offsets = [0, 24], sizes = [16, 8], strides = [1, 1]} : vector<16x32xbf16> to vector<16x8xbf16>
    %282 = vector.extract_strided_slice %223 {offsets = [24, 0], sizes = [8, 16], strides = [1, 1]} : vector<32x16xbf16> to vector<8x16xbf16>
    %cst_76 = arith.constant dense<0.000000e+00> : vector<16x16xf32>
    %283 = tpu.matmul %281, %282, %cst_76 {dimension_numbers = #tpu.dot_dimension_numbers<[1], [0], [0], [1], [0, 0, 1, 1], [], []>} : vector<16x8xbf16>, vector<8x16xbf16>, vector<16x16xf32> -> vector<16x16xf32>
    %284 = vector.broadcast %34 : vector<1x16xf32> to vector<16x16xf32>
    %285 = arith.addf %283, %284 : vector<16x16xf32>
    %cst_77 = arith.constant dense<0xFF800000> : vector<16xf32>
    %286 = vector.multi_reduction <maximumf>, %285, %cst_77 [1] : vector<16x16xf32> to vector<16xf32>
    %287 = vector.shape_cast %286 : vector<16xf32> to vector<16x1xf32>
    %288 = vector.broadcast %287 : vector<16x1xf32> to vector<16x16xf32>
    %289 = arith.subf %285, %288 : vector<16x16xf32>
    %290 = math.exp %289 : vector<16x16xf32>
    %cst_78 = arith.constant dense<0.000000e+00> : vector<16xf32>
    %291 = vector.multi_reduction <add>, %290, %cst_78 [1] : vector<16x16xf32> to vector<16xf32>
    %292 = vector.shape_cast %291 : vector<16xf32> to vector<16x1xf32>
    %293 = tpu.reciprocal %292 {approx = true} : vector<16x1xf32> -> vector<16x1xf32>
    %294 = vector.broadcast %293 : vector<16x1xf32> to vector<16x16xf32>
    %295 = arith.mulf %290, %294 : vector<16x16xf32>
    %296 = arith.truncf %295 : vector<16x16xf32> to vector<16x16xbf16>
    %297 = vector.extract_strided_slice %221 {offsets = [0, 24], sizes = [16, 8], strides = [1, 1]} : vector<16x32xbf16> to vector<16x8xbf16>
    %cst_79 = arith.constant dense<0.000000e+00> : vector<16x8xf32>
    %298 = tpu.matmul %296, %297, %cst_79 {dimension_numbers = #tpu.dot_dimension_numbers<[1], [0], [0], [1], [0, 0, 1, 1], [], []>} : vector<16x16xbf16>, vector<16x8xbf16>, vector<16x8xf32> -> vector<16x8xf32>
    %c0_80 = arith.constant 0 : index
    %c24_81 = arith.constant 24 : index
    %299 = vector.load %arg7[%c0_80, %c24_81] : memref<16x32xf32, #tpu.memory_space<vmem>>, vector<16x8xf32>
    tpu.vector_store %arg7[%c0_80, %c24_81], %298 {strides = array<i32>} : memref<16x32xf32, #tpu.memory_space<vmem>>, vector<16x8xf32>,
    %c0_82 = arith.constant 0 : index
    %c0_83 = arith.constant 0 : index
    %300 = vector.load %arg7[%c0_82, %c0_83] : memref<16x32xf32, #tpu.memory_space<vmem>>, vector<16x32xf32>
    %301 = arith.truncf %300 : vector<16x32xf32> to vector<16x32xbf16>
    %302 = vector.extract_strided_slice %201 {offsets = [0, 96], sizes = [32, 32], strides = [1, 1]} : vector<32x256xbf16> to vector<32x32xbf16>
    %cst_84 = arith.constant dense<0.000000e+00> : vector<16x32xf32>
    %303 = tpu.matmul %301, %302, %cst_84 {dimension_numbers = #tpu.dot_dimension_numbers<[1], [0], [0], [1], [0, 0, 1, 1], [], []>} : vector<16x32xbf16>, vector<32x32xbf16>, vector<16x32xf32> -> vector<16x32xf32>
    %304 = vector.broadcast %205 : vector<1x32xf32> to vector<16x32xf32>
    %305 = arith.addf %303, %304 : vector<16x32xf32>
    %306 = arith.addf %199, %305 : vector<16x32xf32>
    %cst_85 = arith.constant dense<0.000000e+00> : vector<16xf32>
    %307 = vector.multi_reduction <add>, %306, %cst_85 [1] : vector<16x32xf32> to vector<16xf32>
    %308 = vector.shape_cast %307 : vector<16xf32> to vector<16x1xf32>
    %cst_86 = arith.constant 3.200000e+01 : f32
    %309 = vector.broadcast %cst_86 : f32 to vector<16x1xf32>
    %310 = arith.divf %308, %309 : vector<16x1xf32>
    %311 = vector.broadcast %310 : vector<16x1xf32> to vector<16x32xf32>
    %312 = arith.subf %306, %311 : vector<16x32xf32>
    %313 = arith.mulf %312, %312 : vector<16x32xf32>
    %cst_87 = arith.constant dense<0.000000e+00> : vector<16xf32>
    %314 = vector.multi_reduction <add>, %313, %cst_87 [1] : vector<16x32xf32> to vector<16xf32>
    %315 = vector.shape_cast %314 : vector<16xf32> to vector<16x1xf32>
    %cst_88 = arith.constant 3.200000e+01 : f32
    %316 = vector.broadcast %cst_88 : f32 to vector<16x1xf32>
    %317 = arith.divf %315, %316 : vector<16x1xf32>
    %318 = vector.broadcast %310 : vector<16x1xf32> to vector<16x32xf32>
    %319 = arith.subf %306, %318 : vector<16x32xf32>
    %cst_89 = arith.constant 9.99999974E-6 : f32
    %320 = vector.broadcast %cst_89 : f32 to vector<16x1xf32>
    %321 = arith.addf %317, %320 : vector<16x1xf32>
    %322 = math.rsqrt %321 : vector<16x1xf32>
    %323 = vector.broadcast %322 : vector<16x1xf32> to vector<16x32xf32>
    %324 = arith.mulf %319, %323 : vector<16x32xf32>
    %325 = vector.broadcast %206 : vector<1x32xf32> to vector<16x32xf32>
    %326 = arith.mulf %324, %325 : vector<16x32xf32>
    %327 = vector.broadcast %207 : vector<1x32xf32> to vector<16x32xf32>
    %328 = arith.addf %326, %327 : vector<16x32xf32>
    %329 = arith.truncf %328 : vector<16x32xf32> to vector<16x32xbf16>
    %330 = vector.extract_strided_slice %201 {offsets = [0, 128], sizes = [32, 128], strides = [1, 1]} : vector<32x256xbf16> to vector<32x128xbf16>
    %cst_90 = arith.constant dense<0.000000e+00> : vector<16x128xf32>
    %331 = tpu.matmul %329, %330, %cst_90 {dimension_numbers = #tpu.dot_dimension_numbers<[1], [0], [0], [1], [0, 0, 1, 1], [], []>} : vector<16x32xbf16>, vector<32x128xbf16>, vector<16x128xf32> -> vector<16x128xf32>
    %332 = vector.broadcast %208 : vector<1x128xf32> to vector<16x128xf32>
    %333 = arith.addf %331, %332 : vector<16x128xf32>
    %cst_91 = arith.constant 0.000000e+00 : f32
    %334 = vector.broadcast %cst_91 : f32 to vector<16x128xf32>
    %335 = arith.maximumf %333, %334 : vector<16x128xf32>
    %336 = arith.truncf %335 : vector<16x128xf32> to vector<16x128xbf16>
    %c1_92 = arith.constant 1 : index
    %c0_93 = arith.constant 0 : index
    %c0_94 = arith.constant 0 : index
    %337 = vector.load %arg4[%c1_92, %c0_93, %c0_94] : memref<2x128x32xbf16, #tpu.memory_space<vmem>>, vector<1x128x32xbf16>
    %338 = vector.shape_cast %337 : vector<1x128x32xbf16> to vector<128x32xbf16>
    %cst_95 = arith.constant dense<0.000000e+00> : vector<16x32xf32>
    %339 = tpu.matmul %336, %338, %cst_95 {dimension_numbers = #tpu.dot_dimension_numbers<[1], [0], [0], [1], [0, 0, 1, 1], [], []>} : vector<16x128xbf16>, vector<128x32xbf16>, vector<16x32xf32> -> vector<16x32xf32>
    %340 = vector.broadcast %209 : vector<1x32xf32> to vector<16x32xf32>
    %341 = arith.addf %339, %340 : vector<16x32xf32>
    %342 = arith.addf %328, %341 : vector<16x32xf32>
    %cst_96 = arith.constant dense<0.000000e+00> : vector<16xf32>
    %343 = vector.multi_reduction <add>, %342, %cst_96 [1] : vector<16x32xf32> to vector<16xf32>
    %344 = vector.shape_cast %343 : vector<16xf32> to vector<16x1xf32>
    %cst_97 = arith.constant 3.200000e+01 : f32
    %345 = vector.broadcast %cst_97 : f32 to vector<16x1xf32>
    %346 = arith.divf %344, %345 : vector<16x1xf32>
    %347 = vector.broadcast %346 : vector<16x1xf32> to vector<16x32xf32>
    %348 = arith.subf %342, %347 : vector<16x32xf32>
    %349 = arith.mulf %348, %348 : vector<16x32xf32>
    %cst_98 = arith.constant dense<0.000000e+00> : vector<16xf32>
    %350 = vector.multi_reduction <add>, %349, %cst_98 [1] : vector<16x32xf32> to vector<16xf32>
    %351 = vector.shape_cast %350 : vector<16xf32> to vector<16x1xf32>
    %cst_99 = arith.constant 3.200000e+01 : f32
    %352 = vector.broadcast %cst_99 : f32 to vector<16x1xf32>
    %353 = arith.divf %351, %352 : vector<16x1xf32>
    %354 = vector.broadcast %346 : vector<16x1xf32> to vector<16x32xf32>
    %355 = arith.subf %342, %354 : vector<16x32xf32>
    %cst_100 = arith.constant 9.99999974E-6 : f32
    %356 = vector.broadcast %cst_100 : f32 to vector<16x1xf32>
    %357 = arith.addf %353, %356 : vector<16x1xf32>
    %358 = math.rsqrt %357 : vector<16x1xf32>
    %359 = vector.broadcast %358 : vector<16x1xf32> to vector<16x32xf32>
    %360 = arith.mulf %355, %359 : vector<16x32xf32>
    %361 = vector.broadcast %210 : vector<1x32xf32> to vector<16x32xf32>
    %362 = arith.mulf %360, %361 : vector<16x32xf32>
    %363 = vector.broadcast %211 : vector<1x32xf32> to vector<16x32xf32>
    %364 = arith.addf %362, %363 : vector<16x32xf32>
    %365 = vector.extract_strided_slice %364 {offsets = [0, 0], sizes = [8, 32], strides = [1, 1]} : vector<16x32xf32> to vector<8x32xf32>
    %366 = arith.truncf %365 : vector<8x32xf32> to vector<8x32xbf16>
    %c0_101 = arith.constant 0 : index
    %c0_102 = arith.constant 0 : index
    %367 = vector.load %arg5[%c0_101, %c0_102] : memref<32x128xbf16, #tpu.memory_space<vmem>>, vector<32x128xbf16>
    %cst_103 = arith.constant dense<0.000000e+00> : vector<8x128xf32>
    %368 = tpu.matmul %366, %367, %cst_103 {dimension_numbers = #tpu.dot_dimension_numbers<[1], [0], [0], [1], [0, 0, 1, 1], [], []>} : vector<8x32xbf16>, vector<32x128xbf16>, vector<8x128xf32> -> vector<8x128xf32>
    %369 = vector.broadcast %5 : vector<1x128xf32> to vector<8x128xf32>
    %370 = arith.addf %368, %369 : vector<8x128xf32>
    %c0_104 = arith.constant 0 : index
    %c0_105 = arith.constant 0 : index
    %371 = vector.load %arg6[%c0_104, %c0_105] : memref<8x128xf32, #tpu.memory_space<vmem>>, vector<8x128xf32>
    tpu.vector_store %arg6[%c0_104, %c0_105], %370 {strides = array<i32>} : memref<8x128xf32, #tpu.memory_space<vmem>>, vector<8x128xf32>,
    return
  }
  func.func @transform_0(%arg0: i32) -> (i32, i32, i32) {
    %c0_i32 = arith.constant 0 : i32
    %c0_i32_0 = arith.constant 0 : i32
    %c0_i32_1 = arith.constant 0 : i32
    return %arg0, %c0_i32, %c0_i32_0 : i32, i32, i32
  }
  func.func @transform_1(%arg0: i32) -> (i32, i32, i32) {
    %c0_i32 = arith.constant 0 : i32
    %c0_i32_0 = arith.constant 0 : i32
    %c0_i32_1 = arith.constant 0 : i32
    %c0_i32_2 = arith.constant 0 : i32
    return %c0_i32, %c0_i32_0, %c0_i32_1 : i32, i32, i32
  }
  func.func @transform_2(%arg0: i32) -> (i32, i32, i32) {
    %c0_i32 = arith.constant 0 : i32
    %c0_i32_0 = arith.constant 0 : i32
    %c0_i32_1 = arith.constant 0 : i32
    %c0_i32_2 = arith.constant 0 : i32
    return %c0_i32, %c0_i32_0, %c0_i32_1 : i32, i32, i32
  }
  func.func @transform_3(%arg0: i32) -> (i32, i32, i32) {
    %c0_i32 = arith.constant 0 : i32
    %c0_i32_0 = arith.constant 0 : i32
    %c0_i32_1 = arith.constant 0 : i32
    %c0_i32_2 = arith.constant 0 : i32
    return %c0_i32, %c0_i32_0, %c0_i32_1 : i32, i32, i32
  }
  func.func @transform_4(%arg0: i32) -> (i32, i32) {
    %c0_i32 = arith.constant 0 : i32
    %c0_i32_0 = arith.constant 0 : i32
    %c0_i32_1 = arith.constant 0 : i32
    return %c0_i32, %c0_i32_0 : i32, i32
  }
  func.func @transform_5(%arg0: i32) -> (i32, i32) {
    %c0_i32 = arith.constant 0 : i32
    %c0_i32_0 = arith.constant 0 : i32
    return %arg0, %c0_i32 : i32, i32
  }
}

</mosaic_0001>

<bundles_post_ra>
// kernel: incontext_forward.1
= control target key start
LH: loop header
LB: loop body
LE: loop exit
PB: predicated region body
PF: predicated region fallthrough
CT: control target
= control target key end

     0   :  { %s2785_s18 = smov 0   ;;  %s3265_s0 = inlined_call_operand.vmem [shape: f32[2,16,2], index: 0, kind: input, shape index: {}]   ;;  %s3266_s1 = inlined_call_operand.vmem [shape: f32[3,8,128], index: 1, kind: input, shape index: {}]   ;;  %s3267_s2 = inlined_call_operand.vmem [shape: bf16[2,32,256], index: 2, kind: input, shape index: {}]   ;;  %s3268_s3 = inlined_call_operand.vmem [shape: bf16[2,128,32], index: 3, kind: input, shape index: {}]   ;;  %s3269_s4 = inlined_call_operand.vmem [shape: bf16[32,128], index: 4, kind: input, shape index: {}]   ;;  %s3270_s5 = inlined_call_operand.vmem [shape: f32[16,128], index: 5, kind: output, shape index: {}]  }
   0x1 LB: > { %s2249_s19 = sadd.s32 4294967295, %s2736_s18   ;;  %p2253_p0 = scmp.ge.s32.totalorder %s2736_s18, 1  ;;  %s2736_s18 = sphi %s2785_s18, %s15_s18  }
   0x2   : > { %p187_p1 = scmp.lt.s32.totalorder %s2736_s18, 3 }
   0x4   : > { %p188_p2 = pnand %p2253_p0, %p187_p1 }
   0x5   : > { %p214_p3 = scmp.lt.s32.totalorder (!%p188_p2), %s2249_s19, 1  ;;  %s2742_s7 = smov (!%p188_p2), 96  }
   0x6   : > { %191 = sbr.rel (%p188_p2) target bundleno = 5969 (0x1751), region = 40  ;;  %s2743_s8 = smov (!%p188_p2), 120  }
   0x7   : > { %s2744_s9 = smov (!%p188_p2), 112   ;;  %s2745_s10 = smov (!%p188_p2), 104  }
   0x8   : > { %s2747_s11 = smov (!%p188_p2), 64   ;;  %s2748_s12 = smov (!%p188_p2), 48  }
   0x9   : > { %s2749_s13 = smov (!%p188_p2), 40   ;;  %s2750_s14 = smov (!%p188_p2), 56  }
   0xa   : > { %s2751_s21 = smov (!%p188_p2), 8   ;;  %s2752_s22 = smov (!%p188_p2), 16  }
   0xb   : > { %v2738_v0 = vmov 0   ;;  %s3272_s19 = smov (!%p214_p3, %s2249_s19), 1  ;;  %v2802_v3 = vld [vmem:[%s3267_s2 + $0x10] ss:$8 sps:$4 sm:$0xff]   ;;  %v2739_v4 = vmov 0.0   ;;  %v2740_v5 = vmov 1   ;;  %v238_v7 = vlaneseq }
   0xc   : > { %2621 = vset.pattern.permute.xlu1 %v2738_v0  ;;  %2619 = vset.pattern.permute.xlu0 %v2738_v0  ;;  %s2330_s20 = sshll.u32 %s3272_s19, 4  ;;  %v2810_v6 = vld [vmem:[%s3267_s2] ss:$8 sps:$4 sm:$0xff]   ;;  %vm2741_vm0 = vmmov 0   ;;  %v2257_v11 = vld [vmem:[%s3266_s1 + $0x10] sm:$0xff]  ;;  %vm307_vm2 = vcmask 261120  }
   0xd   : > { %s218_s23 = scalar_lea.vmem %s3265_s0, %s2330_s20  ;;  %2402 = vmatprep.subr.bf16.mxu0 %v2739_v4  ;;  %2416 = vmatprep.subr.bf16.mxu1 %v2739_v4  ;;  %v2820_v8 = vshrl.u32 %v238_v7, 7  ;;  %v2854_v32 = vld [vmem:[%s3266_s1] sm:$0xff]  ;;  %vm399_vm3 = vcmask 1043456   ;;  %vm395_vm4 = vcmask 64512   ;;  %v282_v58 = vand.u32 127, %v238_v7  ;;  %s2754_s24 = smov 32  }
   0xe   : > { %v227_v1 = vld [vmem:[%s218_s23 + $0x8] sm:$0xff]  ;;  %v226_v2 = vld [vmem:[%s218_s23] sm:$0xff]  ;;  %2403 = vmatpush3.bf16.msra.mxu0 %v2802_v3  ;;  %2406 = vmatprep.mubr.msk.bf16.mxu0 %vm2741_vm0, %v2739_v4  ;;  %v2746_v59 = vmov -1e+30   ;;  %vm444_vm6 = vcmask 130048   ;;  %s2753_s23 = smov 24  }
   0xf   : > { %235 = vperm.xlu1 %2621, %v227_v1   ;;  %230 = vperm.xlu0 %2619, %v226_v2   ;;  %v2823_v9 = vsub.s32 2, %v2820_v8  ;;  %v2826_v10 = vsub.s32 3, %v2820_v8  ;;  %v2832_v14 = vsub.s32 1, %v2820_v8  ;;  %v2837_v17 = vsub.s32 0, %v2820_v8 }
  0x10   : > { %2404 = vmatprep.subr.bf16.mxu0 %v2739_v4  ;;  %2418 = vmatprep.mubr.msk.bf16.mxu1 %vm2741_vm0, %v2739_v4  ;;  %vm269_vm1 = vcmp.eq.s32.totalorder %v2820_v8, 0  ;;  %vm283_vm5 = vcmp.lt.s32.totalorder %v282_v58, 9  ;;  %vm647_vm7 = vcmask 130112   ;;  %vm777_vm8 = vcmask 195712  }
  0x11   : > { %v241_v15 = vrot.slane %v2257_v11, %v2823_v9  ;;  %v255_v16 = vrot.slane %v2257_v11, %v2826_v10  ;;  %v263_v18 = vrot.slane %v2257_v11, %v2832_v14  ;;  %v278_v27 = vrot.slane %v2257_v11, %v2837_v17 }
  0x12   : > { %2405 = vmatpush3.bf16.msra.mxu0 %v2810_v6  ;;  %v294_v33 = vrot.slane %v2854_v32, %v2837_v17  ;;  %v2890_v60 = vsel %vm283_vm5, 0.0, %v2746_v59  ;;  %vm909_vm9 = vcmask 261312  }
  0x13   : > { %2622 = vset.pattern.permute.xlu1 %v2740_v5  ;;  %2620 = vset.pattern.permute.xlu0 %v2740_v5 }
  0x14   : > { %249 = vperm.xlu1 %2622, %v227_v1   ;;  %245 = vperm.xlu0 %2620, %v226_v2  }
  0x15   : > { %2410 = vmatprep.subr.bf16.mxu0 %v2739_v4 }
  0x8a   : > { %v231_v12 = vpop.permute.xlu0 %230  ;;  %v236_v13 = vpop.permute.xlu1 %235 }
  0x8b   : > { %v242_v21 = vmul.f32 %v241_v15, %v231_v12  ;;  %v243_v22 = vmul.f32 %v241_v15, %v236_v13 }
  0x8f   : > { %v250_v19 = vpop.permute.xlu1 %249  ;;  %v246_v20 = vpop.permute.xlu0 %245 }
  0x90   : > { %v257_v23 = vmul.f32 %v255_v16, %v250_v19  ;;  %v256_v24 = vmul.f32 %v255_v16, %v246_v20 }
  0x92   : > { %v259_v25 = vadd.f32 %v257_v23, %v243_v22  ;;  %v258_v26 = vadd.f32 %v256_v24, %v242_v21 }
  0x94   : > { %v2842_v28 = vadd.f32 %v263_v18, %v259_v25  ;;  %v264_v29 = vadd.f32 %v263_v18, %v258_v26 }
  0x96   : > { %v2844_v30 = vsel %vm269_vm1, %v278_v27, %v264_v29 }
  0x97   : > { %v290_v31 = vpack.c.bf16 %v2842_v28, %v2844_v30 }
  0x99   : > { %2407 = vmatmul.mubr.msk.bf16.vlgmr.msra.gmra.mxu0 %vm307_vm2, %v290_v31 }
  0x9a   : > { %2412 = vmatprep.mubr.msk.bf16.mxu0 %vm2741_vm0, %v2739_v4 }
 0x159   : > { %v345_v34 = vpop.f32.mrf.mxu0 }
 0x15a   : > { %v346_v35 = vadd.f32 %v345_v34, %v294_v33 }
 0x15b   : > { %v2408_v36 = vpop.f32.mrf.mxu0 }
 0x15c   : > { %355 = vrot.lane.b32.xlu1 %v346_v35, %s2742_s7 }
 0x15d   : > { %v348_v37 = vpop.f32.mrf.mxu0 }
 0x15e   : > { %v349_v38 = vadd.f32 %v348_v37, %v294_v33 }
 0x15f   : > { %v2409_v39 = vpop.f32.mrf.mxu0 }
 0x160   : > { %v2859_v40 = vpack.c.bf16 %v349_v38, %v346_v35  ;;  %357 = vrot.lane.b32.xlu0 %v349_v38, %s2742_s7 }
 0x162   : > { %518 = vrot.lane.b32.xlu1 %v2859_v40, %s2743_s8 }
 0x164   : > { %650 = vrot.lane.b32.xlu0 %v2859_v40, %s2744_s9 }
 0x168   : > { %780 = vrot.lane.b32.xlu0 %v2859_v40, %s2745_s10 }
 0x1ce   : > { %v356_v41 = vpop.permute.xlu1 %355 }
 0x1cf   : > { %361 = vxpose.xlu1.b32.start [1/2] (short) (narrow) %v356_v41, 32 }
 0x1d2   : > { %v358_v42 = vpop.permute.xlu0 %357 }
 0x1d3   : > { %362 = vxpose.xlu1.b32.end [2/2] (short) (narrow) %v358_v42, 32 }
 0x1d4   : > { %v519_v43 = vpop.permute.xlu1 %518 }
 0x1d6   : > { %v651_v55 = vpop.permute.xlu0 %650 }
 0x1da   : > { %v781_v57 = vpop.permute.xlu0 %780 }
 0x24b   : > { %v377_v44 = vpop.trf.xlu1 }
 0x24f   : > { %v378_v45 = vpop.trf.xlu1 }
 0x250   : > { %v393_v46 = vpack.c.bf16 %v378_v45, %v377_v44 }
 0x252   : > { %v401_v47 = vsel %vm399_vm3, %v393_v46, 0  ;;  %v521_v48 = vrot.slane %v393_v46, 4 }
 0x253   : > { %2411 = vmatpush3.bf16.msra.mxu0 %v401_v47  ;;  %v379_v49 = vpop.trf.xlu1 }
 0x254   : > { %2422 = vmatprep.subr.bf16.mxu0 %v2739_v4  ;;  %v526_v50 = vsel %vm399_vm3, %v521_v48, 0 }
 0x256   : > { %2413 = vmatmul.mubr.msk.bf16.vlgmr.msra.gmra.mxu0 %vm395_vm4, %v2859_v40 }
 0x257   : > { %2423 = vmatpush3.bf16.msra.mxu0 %v526_v50  ;;  %v380_v51 = vpop.trf.xlu1  ;;  %2424 = vmatprep.mubr.msk.bf16.mxu0 %vm2741_vm0, %v2739_v4 }
 0x258   : > { %v394_v52 = vpack.c.bf16 %v380_v51, %v379_v49  ;;  %2434 = vmatprep.subr.bf16.mxu0 %v2739_v4 }
 0x25a   : > { %v656_v53 = vsel %vm399_vm3, %v394_v52, 0  ;;  %v783_v54 = vrot.slane %v394_v52, 4 }
 0x25c   : > { %v788_v56 = vsel %vm399_vm3, %v783_v54, 0 }
 0x25e   : > { %2425 = vmatmul.mubr.msk.bf16.vlgmr.msra.gmra.mxu0 %vm395_vm4, %v519_v43 }
 0x25f   : > { %2435 = vmatpush3.bf16.msra.mxu0 %v656_v53  ;;  %2436 = vmatprep.mubr.msk.bf16.mxu0 %vm2741_vm0, %v2739_v4 }
 0x260   : > { %2446 = vmatprep.subr.bf16.mxu0 %v2739_v4 }
 0x266   : > { %2437 = vmatmul.mubr.msk.bf16.vlgmr.msra.gmra.mxu0 %vm395_vm4, %v651_v55 }
 0x267   : > { %2447 = vmatpush3.bf16.msra.mxu0 %v788_v56  ;;  %2448 = vmatprep.mubr.msk.bf16.mxu0 %vm2741_vm0, %v2739_v4 }
 0x268   : > { %2458 = vmatprep.subr.bf16.mxu0 %v2739_v4 }
 0x26e   : > { %2449 = vmatmul.mubr.msk.bf16.vlgmr.msra.gmra.mxu0 %vm395_vm4, %v781_v57 }
 0x26f   : > { %2462 = vmatprep.mubr.msk.bf16.mxu0 %vm2741_vm0, %v2739_v4 }
 0x316   : > { %v437_v61 = vpop.f32.mrf.mxu0 }
 0x317   : > { %v438_v62 = vadd.f32 %v437_v61, %v2890_v60 }
 0x318   : > { %v2414_v63 = vpop.f32.mrf.mxu0 }
 0x319   : > { %v445_v0 = vsel %vm444_vm6, %v438_v62, -inf }
 0x31a   : > { %446 = vmax.xlane.f32.xlu0 %v445_v0  ;;  %v440_v1 = vpop.f32.mrf.mxu0 }
 0x31b   : > { %v441_v2 = vadd.f32 %v440_v1, %v2890_v60 }
 0x31c   : > { %v2415_v5 = vpop.f32.mrf.mxu0 }
 0x31d   : > { %v448_v11 = vsel %vm444_vm6, %v441_v2, -inf }
 0x31e   : > { %449 = vmax.xlane.f32.xlu0 %v448_v11  ;;  %v562_v7 = vpop.f32.mrf.mxu0 }
 0x31f   : > { %v563_v12 = vadd.f32 %v562_v7, %v2890_v60 }
 0x320   : > { %v2426_v13 = vpop.f32.mrf.mxu0 }
 0x321   : > { %v569_v15 = vsel %vm444_vm6, %v563_v12, -inf }
 0x322   : > { %570 = vmax.xlane.f32.xlu0 %v569_v15  ;;  %v565_v16 = vpop.f32.mrf.mxu0 }
 0x323   : > { %v566_v18 = vadd.f32 %v565_v16, %v2890_v60 }
 0x324   : > { %v2427_v19 = vpop.f32.mrf.mxu0 }
 0x325   : > { %v572_v20 = vsel %vm444_vm6, %v566_v18, -inf }
 0x326   : > { %573 = vmax.xlane.f32.xlu1 %v572_v20  ;;  %v692_v21 = vpop.f32.mrf.mxu0 }
 0x327   : > { %v693_v22 = vadd.f32 %v692_v21, %v2890_v60 }
 0x328   : > { %v2438_v23 = vpop.f32.mrf.mxu0 }
 0x329   : > { %v699_v24 = vsel %vm444_vm6, %v693_v22, -inf }
 0x32a   : > { %700 = vmax.xlane.f32.xlu0 %v699_v24  ;;  %v695_v25 = vpop.f32.mrf.mxu0 }
 0x32b   : > { %v696_v26 = vadd.f32 %v695_v25, %v2890_v60 }
 0x32c   : > { %v2439_v27 = vpop.f32.mrf.mxu0 }
 0x32d   : > { %v702_v29 = vsel %vm444_vm6, %v696_v26, -inf }
 0x32e   : > { %703 = vmax.xlane.f32.xlu0 %v702_v29  ;;  %v824_v31 = vpop.f32.mrf.mxu0 }
 0x32f   : > { %v825_v33 = vadd.f32 %v824_v31, %v2890_v60 }
 0x330   : > { %v2450_v34 = vpop.f32.mrf.mxu0 }
 0x331   : > { %v831_v35 = vsel %vm444_vm6, %v825_v33, -inf }
 0x332   : > { %832 = vmax.xlane.f32.xlu0 %v831_v35  ;;  %v827_v36 = vpop.f32.mrf.mxu0 }
 0x333   : > { %v828_v37 = vadd.f32 %v827_v36, %v2890_v60 }
 0x334   : > { %v2451_v38 = vpop.f32.mrf.mxu0 }
 0x335   : > { %v834_v39 = vsel %vm444_vm6, %v828_v37, -inf }
 0x336   : > { %835 = vmax.xlane.f32.xlu0 %v834_v39 }
 0x337   : > { %469 = vrot.lane.b32.xlu1 %v2859_v40, %s2747_s11 }
 0x33b   : > { %722 = vrot.lane.b32.xlu1 %v2859_v40, %s2748_s12 }
 0x33f   : > { %854 = vrot.lane.b32.xlu1 %v2859_v40, %s2749_s13 }
 0x3a3   : > { %v447_v41 = vpop.xlane.xlu0 %446 }
 0x3a4   : > { %v451_v42 = vsub.f32 %v438_v62, %v447_v41 }
 0x3a6   : > { %v453_v43 = vmul.f32 1.442695, %v451_v42 }
 0x3a7   : > { %v450_v44 = vpop.xlane.xlu0 %449 }
 0x3a8   : > { %2651 = vpow2.f32 %v453_v43  ;;  %v452_v45 = vsub.f32 %v441_v2, %v450_v44 }
 0x3aa   : > { %v455_v46 = vmul.f32 1.442695, %v452_v45 }
 0x3ab   : > { %v571_v47 = vpop.xlane.xlu0 %570 }
 0x3ac   : > { %2653 = vpow2.f32 %v455_v46  ;;  %v575_v48 = vsub.f32 %v563_v12, %v571_v47 }
 0x3ae   : > { %v577_v49 = vmul.f32 1.442695, %v575_v48 }
 0x3af   : > { %v574_v50 = vpop.xlane.xlu1 %573 }
 0x3b0   : > { %2655 = vpow2.f32 %v577_v49  ;;  %v576_v51 = vsub.f32 %v566_v18, %v574_v50 }
 0x3b2   : > { %v579_v52 = vmul.f32 1.442695, %v576_v51 }
 0x3b3   : > { %v470_v53 = vpop.permute.xlu1 %469  ;;  %v701_v54 = vpop.xlane.xlu0 %700 }
 0x3b4   : > { %2657 = vpow2.f32 %v579_v52  ;;  %v705_v55 = vsub.f32 %v693_v22, %v701_v54  ;;  %2417 = vmatpush3.bf16.msra.mxu1 %v470_v53 }
 0x3b5   : > { %v2652_v56 = vpop.eup %2651  ;;  %2428 = vmatprep.subr.bf16.mxu1 %v2739_v4 }
 0x3b6   : > { %v707_v57 = vmul.f32 1.442695, %v705_v55  ;;  %v457_v58 = vsel %vm444_vm6, %v2652_v56, 0.0 }
 0x3b7   : > { %v704_v59 = vpop.xlane.xlu0 %703  ;;  %458 = vadd.xlane.f32.xlu0 %v457_v58  ;;  %v723_v50 = vpop.permute.xlu1 %722 }
 0x3b8   : > { %2659 = vpow2.f32 %v707_v57  ;;  %v706_v61 = vsub.f32 %v696_v26, %v704_v59 }
 0x3b9   : > { %v2654_v62 = vpop.eup %2653 }
 0x3ba   : > { %v709_v63 = vmul.f32 1.442695, %v706_v61  ;;  %v460_v0 = vsel %vm444_vm6, %v2654_v62, 0.0  ;;  %v2625_v61 = vld [vmem:[%s3267_s2 + $0x14] ss:$8 sps:$4 sm:$0xff]  }
 0x3bb   : > { %v833_v1 = vpop.xlane.xlu0 %832  ;;  %461 = vadd.xlane.f32.xlu0 %v460_v0 }
 0x3bc   : > { %2661 = vpow2.f32 %v709_v63  ;;  %v837_v2 = vsub.f32 %v825_v33, %v833_v1  ;;  %v2628_v63 = vld [vmem:[%s3267_s2 + $0x4] ss:$8 sps:$4 sm:$0xff]  }
 0x3bd   : > { %v2656_v5 = vpop.eup %2655 }
 0x3be   : > { %v839_v11 = vmul.f32 1.442695, %v837_v2  ;;  %v581_v7 = vsel %vm444_vm6, %v2656_v5, 0.0 }
 0x3bf   : > { %582 = vadd.xlane.f32.xlu0 %v581_v7  ;;  %v836_v12 = vpop.xlane.xlu0 %835 }
 0x3c0   : > { %2663 = vpow2.f32 %v839_v11  ;;  %v838_v13 = vsub.f32 %v828_v37, %v836_v12 }
 0x3c1   : > { %v2658_v15 = vpop.eup %2657 }
 0x3c2   : > { %v841_v16 = vmul.f32 1.442695, %v838_v13  ;;  %v584_v18 = vsel %vm444_vm6, %v2658_v15, 0.0 }
 0x3c3   : > { %585 = vadd.xlane.f32.xlu0 %v584_v18 }
 0x3c4   : > { %2665 = vpow2.f32 %v841_v16 }
 0x3c5   : > { %v2660_v19 = vpop.eup %2659 }
 0x3c6   : > { %v711_v20 = vsel %vm444_vm6, %v2660_v19, 0.0 }
 0x3c7   : > { %712 = vadd.xlane.f32.xlu0 %v711_v20 }
 0x3c9   : > { %v2662_v21 = vpop.eup %2661 }
 0x3ca   : > { %v714_v22 = vsel %vm444_vm6, %v2662_v21, 0.0 }
 0x3cb   : > { %715 = vadd.xlane.f32.xlu0 %v714_v22 }
 0x3cd   : > { %v2664_v23 = vpop.eup %2663 }
 0x3ce   : > { %v843_v24 = vsel %vm444_vm6, %v2664_v23, 0.0 }
 0x3cf   : > { %844 = vadd.xlane.f32.xlu0 %v843_v24 }
 0x3d1   : > { %v2666_v25 = vpop.eup %2665 }
 0x3d2   : > { %v846_v26 = vsel %vm444_vm6, %v2666_v25, 0.0 }
 0x3d3   : > { %847 = vadd.xlane.f32.xlu0 %v846_v26 }
 0x3e9   : > { %592 = vrot.lane.b32.xlu0 %v2859_v40, %s2750_s14 }
 0x440   : > { %v459_v27 = vpop.xlane.xlu0 %458 }
 0x441   : > { %2667 = vrcp.f32 %v459_v27 }
 0x444   : > { %v462_v29 = vpop.xlane.xlu0 %461 }
 0x445   : > { %2669 = vrcp.f32 %v462_v29 }
 0x448   : > { %v583_v31 = vpop.xlane.xlu0 %582 }
 0x44c   : > { %v586_v33 = vpop.xlane.xlu0 %585 }
 0x44d   : > { %2671 = vrcp.f32 %v586_v33 }
 0x44e   : > { %v2668_v34 = vpop.eup %2667  ;;  %2673 = vrcp.f32 %v583_v31 }
 0x44f   : > { %v465_v37 = vmul.f32 %v2668_v34, %v2652_v56  ;;  %v855_v56 = vpop.permute.xlu1 %854 }
 0x450   : > { %v713_v35 = vpop.xlane.xlu0 %712 }
 0x452   : > { %v2670_v36 = vpop.eup %2669 }
 0x453   : > { %v466_v38 = vmul.f32 %v2670_v36, %v2654_v62  ;;  %v918_v36 = vrot.slane %v2854_v32, %v2832_v14 }
 0x454   : > { %v716_v39 = vpop.xlane.xlu0 %715 }
 0x455   : > { %v467_v41 = vpack.c.bf16 %v466_v38, %v465_v37  ;;  %2675 = vrcp.f32 %v716_v39 }
 0x456   : > { %2677 = vrcp.f32 %v713_v35 }
 0x457   : > { %2419 = vmatmul.mubr.msk.bf16.vlgmr.msra.gmra.mxu1 %vm444_vm6, %v467_v41 }
 0x458   : > { %v845_v40 = vpop.xlane.xlu0 %844  ;;  %2430 = vmatprep.mubr.msk.bf16.mxu1 %vm2741_vm0, %v2739_v4 }
 0x45a   : > { %v2672_v42 = vpop.eup %2671 }
 0x45b   : > { %v2674_v44 = vpop.eup %2673  ;;  %v590_v45 = vmul.f32 %v2672_v42, %v2658_v15 }
 0x45c   : > { %v848_v43 = vpop.xlane.xlu0 %847  ;;  %v589_v47 = vmul.f32 %v2674_v44, %v2656_v5 }
 0x45d   : > { %2679 = vrcp.f32 %v848_v43 }
 0x45e   : > { %2681 = vrcp.f32 %v845_v40  ;;  %v591_v48 = vpack.c.bf16 %v590_v45, %v589_v47 }
 0x460   : > { %v593_v46 = vpop.permute.xlu0 %592 }
 0x461   : > { %2429 = vmatpush3.bf16.msra.mxu1 %v593_v46 }
 0x462   : > { %2440 = vmatprep.subr.bf16.mxu1 %v2739_v4  ;;  %v2676_v49 = vpop.eup %2675 }
 0x463   : > { %v2678_v51 = vpop.eup %2677  ;;  %v720_v52 = vmul.f32 %v2676_v49, %v2662_v21 }
 0x464   : > { %2431 = vmatmul.mubr.msk.bf16.vlgmr.msra.gmra.mxu1 %vm444_vm6, %v591_v48  ;;  %v719_v53 = vmul.f32 %v2678_v51, %v2660_v19 }
 0x465   : > { %2441 = vmatpush3.bf16.msra.mxu1 %v723_v50  ;;  %2442 = vmatprep.mubr.msk.bf16.mxu1 %vm2741_vm0, %v2739_v4 }
 0x466   : > { %2452 = vmatprep.subr.bf16.mxu1 %v2739_v4  ;;  %v721_v54 = vpack.c.bf16 %v720_v52, %v719_v53 }
 0x46a   : > { %v2680_v55 = vpop.eup %2679 }
 0x46b   : > { %v2682_v57 = vpop.eup %2681  ;;  %v852_v58 = vmul.f32 %v2680_v55, %v2666_v25 }
 0x46c   : > { %2443 = vmatmul.mubr.msk.bf16.vlgmr.msra.gmra.mxu1 %vm444_vm6, %v721_v54  ;;  %v851_v59 = vmul.f32 %v2682_v57, %v2664_v23  ;;  %v2631_v57 = vld [vmem:[%s3268_s3 + $0x28] sm:$0xff]  }
 0x46d   : > { %2453 = vmatpush3.bf16.msra.mxu1 %v855_v56  ;;  %2454 = vmatprep.mubr.msk.bf16.mxu1 %vm2741_vm0, %v2739_v4  ;;  %v2630_v56 = vld [vmem:[%s3268_s3 + $0x30] sm:$0xff]  }
 0x46e   : > { %2466 = vmatprep.subr.bf16.mxu1 %v2739_v4  ;;  %v853_v62 = vpack.c.bf16 %v852_v58, %v851_v59  ;;  %v2632_v58 = vld [vmem:[%s3268_s3 + $0x20] sm:$0xff]   ;;  %v2633_v59 = vld [vmem:[%s3268_s3 + $0x18] sm:$0xff]  }
 0x474   : > { %2455 = vmatmul.mubr.msk.bf16.vlgmr.msra.gmra.mxu1 %vm444_vm6, %v853_v62 }
 0x475   : > { %2467 = vmatpush3.bf16.msra.mxu1 %v2625_v61  ;;  %2470 = vmatprep.mubr.msk.bf16.mxu1 %vm2741_vm0, %v2739_v4 }
 0x476   : > { %2468 = vmatprep.subr.bf16.mxu1 %v2739_v4 }
 0x479   : > { %2469 = vmatpush3.bf16.msra.mxu1 %v2628_v63 }
 0x47a   : > { %2494 = vmatprep.subr.bf16.mxu1 %v2739_v4 }
 0x517   : > { %v509_v0 = vpop.f32.mrf.mxu1 }
 0x518   : > { %516 = vst.msk [vmem:[#allocation2] sm:$0xff] %vm395_vm4, %v509_v0 }
 0x519   : > { %v2420_v1 = vpop.f32.mrf.mxu1 }
 0x51b   : > { %v512_v2 = vpop.f32.mrf.mxu1 }
 0x51c   : > { %517 = vst.msk [vmem:[#allocation2 + $0x8] sm:$0xff] %vm395_vm4, %v512_v2 }
 0x51d   : > { %v2421_v5 = vpop.f32.mrf.mxu1 }
 0x51e   : > { %v1001_v5 = vrot.slane %v2854_v32, %v2823_v9 }
 0x524   : > { %v632_v11 = vpop.f32.mrf.mxu1 }
 0x525   : > { %641 = vrot.lane.b32.xlu0 %v632_v11, %s2751_s21 }
 0x526   : > { %v2432_v7 = vpop.f32.mrf.mxu1 }
 0x527   : > { %v1007_v7 = vrot.slane %v2854_v32, %v2826_v10 }
 0x528   : > { %v635_v12 = vpop.f32.mrf.mxu1 }
 0x529   : > { %643 = vrot.lane.b32.xlu1 %v635_v12, %s2751_s21 }
 0x52a   : > { %v2433_v13 = vpop.f32.mrf.mxu1 }
 0x52c   : > { %v762_v15 = vpop.f32.mrf.mxu1 }
 0x52d   : > { %771 = vrot.lane.b32.xlu0 %v762_v15, %s2752_s22 }
 0x52e   : > { %v2444_v16 = vpop.f32.mrf.mxu1 }
 0x530   : > { %v765_v18 = vpop.f32.mrf.mxu1 }
 0x531   : > { %773 = vrot.lane.b32.xlu1 %v765_v18, %s2752_s22 }
 0x532   : > { %v2445_v19 = vpop.f32.mrf.mxu1 }
 0x534   : > { %v894_v20 = vpop.f32.mrf.mxu1 }
 0x535   : > { %903 = vrot.lane.b32.xlu0 %v894_v20, %s2753_s23 }
 0x536   : > { %v2456_v21 = vpop.f32.mrf.mxu1 }
 0x538   : > { %v897_v22 = vpop.f32.mrf.mxu1 }
 0x539   : > { %905 = vrot.lane.b32.xlu1 %v897_v22, %s2753_s23  ;;  %921 = vrot.lane.b32.xlu0 %v2802_v3, %s2754_s24  ;;  %v2634_v22 = vld [vmem:[%s3268_s3 + $0x10] sm:$0xff]  }
 0x53a   : > { %v2457_v23 = vpop.f32.mrf.mxu1 }
 0x53b   : > { %v2635_v23 = vld [vmem:[%s3268_s3 + $0x8] sm:$0xff]  }
 0x53d   : > { %919 = vrot.lane.b32.xlu1 %v2810_v6, %s2754_s24 }
 0x597   : > { %v642_v24 = vpop.permute.xlu0 %641 }
 0x598   : > { %648 = vst.msk [vmem:[#allocation2] sm:$0xff] %vm647_vm7, %v642_v24  ;;  %v2636_v24 = vld [vmem:[%s3268_s3] sm:$0xff]  }
 0x59b   : > { %v644_v25 = vpop.permute.xlu1 %643 }
 0x59c   : > { %649 = vst.msk [vmem:[#allocation2 + $0x8] sm:$0xff] %vm647_vm7, %v644_v25  ;;  %v3019_v25 = vsub.s32 4, %v2820_v8 }
 0x59f   : > { %v772_v26 = vpop.permute.xlu0 %771 }
 0x5a0   : > { %778 = vst.msk [vmem:[#allocation2] sm:$0xff] %vm777_vm8, %v772_v26  ;;  %v1014_v26 = vrot.slane %v2854_v32, %v3019_v25 }
 0x5a3   : > { %v774_v27 = vpop.permute.xlu1 %773 }
 0x5a4   : > { %779 = vst.msk [vmem:[#allocation2 + $0x8] sm:$0xff] %vm777_vm8, %v774_v27 }
 0x5a7   : > { %v904_v3 = vpop.permute.xlu0 %903 }
 0x5a8   : > { %910 = vst.msk [vmem:[#allocation2] sm:$0xff] %vm909_vm9, %v904_v3 }
 0x5ab   : > { %v906_v29 = vpop.permute.xlu1 %905  ;;  %v922_v6 = vpop.permute.xlu0 %921 }
 0x5ac   : > { %911 = vst.msk [vmem:[#allocation2 + $0x8] sm:$0xff] %vm909_vm9, %v906_v29  ;;  %2459 = vmatpush3.bf16.msra.mxu0 %v922_v6 }
 0x5ad   : > { %2460 = vmatprep.subr.bf16.mxu0 %v2739_v4 }
 0x5af   : > { %v920_v31 = vpop.permute.xlu1 %919  ;;  %v912_v33 = vld [vmem:[#allocation2] sm:$0xff] }
 0x5b0   : > { %2461 = vmatpush3.bf16.msra.mxu0 %v920_v31 }
 0x5b1   : > { %2474 = vmatprep.subr.bf16.mxu0 %v2739_v4 }
 0x5b3   : > { %v913_v34 = vld [vmem:[#allocation2 + $0x8] sm:$0xff] }
 0x5b4   : > { %v914_v35 = vpack.c.bf16 %v913_v34, %v912_v33 }
 0x5b6   : > { %2463 = vmatmul.mubr.msk.bf16.vlgmr.msra.gmra.mxu0 %vm307_vm2, %v914_v35 }
 0x5b7   : > { %2490 = vmatprep.mubr.msk.bf16.mxu0 %vm2741_vm0, %v2739_v4 }
 0x676   : > { %v962_v37 = vpop.f32.mrf.mxu0 }
 0x677   : > { %v963_v38 = vadd.f32 %v962_v37, %v918_v36  ;;  %v1088_v37 = vsub.s32 5, %v2820_v8 }
 0x678   : > { %v2464_v39 = vpop.f32.mrf.mxu0 }
 0x679   : > { %v969_v41 = vadd.f32 %v963_v38, %v2844_v30  ;;  %v1089_v38 = vrot.slane %v2854_v32, %v1088_v37 }
 0x67a   : > { %v965_v40 = vpop.f32.mrf.mxu0 }
 0x67b   : > { %v966_v42 = vadd.f32 %v965_v40, %v918_v36  ;;  %v971_v43 = vsel %vm307_vm2, %v969_v41, 0.0 }
 0x67c   : > { %972 = vadd.xlane.f32.xlu0 %v971_v43  ;;  %v2465_v44 = vpop.f32.mrf.mxu0 }
 0x67d   : > { %v970_v45 = vadd.f32 %v966_v42, %v2842_v28  ;;  %v2629_v28 = vld [vmem:[%s3268_s3 + $0x38] sm:$0xff]  }
 0x67e   : > { %2475 = vmatpush3.bf16.msra.mxu0 %v2629_v28 }
 0x67f   : > { %v974_v46 = vsel %vm307_vm2, %v970_v45, 0.0  ;;  %2476 = vmatprep.subr.bf16.mxu0 %v2739_v4 }
 0x680   : > { %975 = vadd.xlane.f32.xlu1 %v974_v46 }
 0x682   : > { %2477 = vmatpush3.bf16.msra.mxu0 %v2630_v56 }
 0x683   : > { %2478 = vmatprep.subr.bf16.mxu0 %v2739_v4 }
 0x686   : > { %2479 = vmatpush3.bf16.msra.mxu0 %v2631_v57  ;;  %v3036_v57 = vld [vmem:[%s3267_s2 + $0x30] ss:$8 sps:$4 sm:$0xff]  }
 0x687   : > { %2480 = vmatprep.subr.bf16.mxu0 %v2739_v4 }
 0x68a   : > { %2481 = vmatpush3.bf16.msra.mxu0 %v2632_v58  ;;  %v3042_v58 = vld [vmem:[%s3267_s2 + $0x20] ss:$8 sps:$4 sm:$0xff]  }
 0x68b   : > { %2482 = vmatprep.subr.bf16.mxu0 %v2739_v4 }
 0x68e   : > { %2483 = vmatpush3.bf16.msra.mxu0 %v2633_v59 }
 0x68f   : > { %2484 = vmatprep.subr.bf16.mxu0 %v2739_v4 }
 0x692   : > { %2485 = vmatpush3.bf16.msra.mxu0 %v2634_v22 }
 0x693   : > { %2486 = vmatprep.subr.bf16.mxu0 %v2739_v4 }
 0x696   : > { %2487 = vmatpush3.bf16.msra.mxu0 %v2635_v23  ;;  %v3067_v23 = vld [vmem:[%s3266_s1 + $0x8] sm:$0xff] }
 0x697   : > { %2488 = vmatprep.subr.bf16.mxu0 %v2739_v4 }
 0x69a   : > { %2489 = vmatpush3.bf16.msra.mxu0 %v2636_v24 }
 0x69b   : > { %2520 = vmatprep.subr.bf16.mxu0 %v2739_v4 }
 0x705   : > { %v973_v47 = vpop.xlane.xlu0 %972 }
 0x706   : > { %v978_v48 = vmul.f32 0.03125, %v973_v47 }
 0x708   : > { %v980_v49 = vsub.f32 %v969_v41, %v978_v48 }
 0x709   : > { %v976_v50 = vpop.xlane.xlu1 %975 }
 0x70a   : > { %v979_v51 = vmul.f32 0.03125, %v976_v50  ;;  %v982_v52 = vmul.f32 %v980_v49, %v980_v49 }
 0x70c   : > { %v981_v53 = vsub.f32 %v970_v45, %v979_v51  ;;  %v984_v30 = vsel %vm307_vm2, %v982_v52, 0.0 }
 0x70d   : > { %985 = vadd.xlane.f32.xlu0 %v984_v30 }
 0x70e   : > { %v983_v54 = vmul.f32 %v981_v53, %v981_v53 }
 0x710   : > { %v987_v55 = vsel %vm307_vm2, %v983_v54, 0.0 }
 0x711   : > { %988 = vadd.xlane.f32.xlu0 %v987_v55 }
 0x796   : > { %v986_v61 = vpop.xlane.xlu0 %985 }
 0x797   : > { %v990_v62 = vmul.f32 0.03125, %v986_v61 }
 0x799   : > { %v992_v63 = vadd.f32 1e-05, %v990_v62 }
 0x79a   : > { %v989_v0 = vpop.xlane.xlu0 %988 }
 0x79b   : > { %2683 = vrsqrt.f32 %v992_v63  ;;  %v991_v1 = vmul.f32 0.03125, %v989_v0 }
 0x79d   : > { %v993_v2 = vadd.f32 1e-05, %v991_v1 }
 0x79f   : > { %2685 = vrsqrt.f32 %v993_v2  ;;  %v1209_v2 = vsub.s32 6, %v2820_v8 }
 0x7a8   : > { %v2684_v11 = vpop.eup %2683 }
 0x7a9   : > { %v996_v12 = vmul.f32 %v2684_v11, %v980_v49 }
 0x7ab   : > { %v1002_v13 = vmul.f32 %v1001_v5, %v996_v12  ;;  %v1215_v12 = vsub.s32 7, %v2820_v8 }
 0x7ac   : > { %v2686_v15 = vpop.eup %2685 }
 0x7ad   : > { %v997_v16 = vmul.f32 %v2686_v15, %v981_v53  ;;  %v1008_v18 = vadd.f32 %v1007_v7, %v1002_v13 }
 0x7af   : > { %v1003_v19 = vmul.f32 %v1001_v5, %v997_v16 }
 0x7b1   : > { %v1009_v20 = vadd.f32 %v1007_v7, %v1003_v19  ;;  %v1210_v7 = vrot.slane %v2854_v32, %v1209_v2 }
 0x7b3   : > { %v1010_v21 = vpack.c.bf16 %v1009_v20, %v1008_v18 }
 0x7b5   : > { %2471 = vmatmul.mubr.msk.bf16.vlgmr.msra.gmra.mxu1 %vm307_vm2, %v1010_v21 }
 0x7b6   : > { %2498 = vmatprep.mubr.msk.bf16.mxu1 %vm2741_vm0, %v2739_v4  ;;  %2495 = vmatpush3.bf16.msra.mxu1 %v3036_v57 }
 0x7b7   : > { %2496 = vmatprep.subr.bf16.mxu1 %v2739_v4 }
 0x7ba   : > { %2497 = vmatpush3.bf16.msra.mxu1 %v3042_v58 }
 0x7bb   : > { %2502 = vmatprep.subr.bf16.mxu1 %v2739_v4 }
 0x875   : > { %v1060_v27 = vpop.f32.mrf.mxu1 }
 0x876   : > { %v1061_v29 = vadd.f32 %v1060_v27, %v1014_v26 }
 0x877   : > { %v2472_v3 = vpop.f32.mrf.mxu1 }
 0x878   : > { %v1067_v34 = vmax.f32 %v1061_v29, 0.0 }
 0x879   : > { %v1063_v6 = vpop.f32.mrf.mxu1 }
 0x87a   : > { %v1064_v31 = vadd.f32 %v1063_v6, %v1014_v26 }
 0x87b   : > { %v2473_v33 = vpop.f32.mrf.mxu1 }
 0x87c   : > { %v1068_v35 = vmax.f32 %v1064_v31, 0.0 }
 0x87e   : > { %v1069_v36 = vpack.c.bf16 %v1068_v35, %v1067_v34 }
 0x880   : > { %2491 = vmatmul.mubr.bf16.vlgmr.msra.gmra.mxu0 %v1069_v36 }
 0x881   : > { %2522 = vmatprep.mubr.msk.bf16.mxu0 %vm2741_vm0, %v2739_v4 }
 0x940   : > { %v1172_v39 = vpop.f32.mrf.mxu0 }
 0x941   : > { %v1173_v41 = vadd.f32 %v1172_v39, %v1089_v38 }
 0x942   : > { %v2492_v40 = vpop.f32.mrf.mxu0 }
 0x943   : > { %v1179_v42 = vadd.f32 %v1173_v41, %v1008_v18  ;;  %v1216_v18 = vrot.slane %v2854_v32, %v1215_v12  ;;  %v1230_v32 = vrot.slane %v3067_v23, %v2837_v17 }
 0x944   : > { %v1175_v43 = vpop.f32.mrf.mxu0 }
 0x945   : > { %v1176_v44 = vadd.f32 %v1175_v43, %v1089_v38  ;;  %v1181_v45 = vsel %vm307_vm2, %v1179_v42, 0.0 }
 0x946   : > { %1182 = vadd.xlane.f32.xlu1 %v1181_v45  ;;  %v2493_v46 = vpop.f32.mrf.mxu0 }
 0x947   : > { %v1180_v47 = vadd.f32 %v1176_v44, %v1009_v20 }
 0x949   : > { %v1184_v48 = vsel %vm307_vm2, %v1180_v47, 0.0 }
 0x94a   : > { %1185 = vadd.xlane.f32.xlu0 %v1184_v48 }
 0x9cf   : > { %v1183_v49 = vpop.xlane.xlu1 %1182 }
 0x9d0   : > { %v1187_v50 = vmul.f32 0.03125, %v1183_v49 }
 0x9d2   : > { %v1189_v51 = vsub.f32 %v1179_v42, %v1187_v50 }
 0x9d3   : > { %v1186_v52 = vpop.xlane.xlu0 %1185 }
 0x9d4   : > { %v1188_v53 = vmul.f32 0.03125, %v1186_v52  ;;  %v1191_v30 = vmul.f32 %v1189_v51, %v1189_v51 }
 0x9d6   : > { %v1190_v54 = vsub.f32 %v1180_v47, %v1188_v53  ;;  %v1193_v55 = vsel %vm307_vm2, %v1191_v30, 0.0 }
 0x9d7   : > { %1194 = vadd.xlane.f32.xlu1 %v1193_v55 }
 0x9d8   : > { %v1192_v28 = vmul.f32 %v1190_v54, %v1190_v54 }
 0x9da   : > { %v1196_v56 = vsel %vm307_vm2, %v1192_v28, 0.0 }
 0x9db   : > { %1197 = vadd.xlane.f32.xlu0 %v1196_v56 }
 0xa60   : > { %v1195_v59 = vpop.xlane.xlu1 %1194 }
 0xa61   : > { %v1199_v61 = vmul.f32 0.03125, %v1195_v59 }
 0xa63   : > { %v1201_v62 = vadd.f32 1e-05, %v1199_v61 }
 0xa64   : > { %v1198_v63 = vpop.xlane.xlu0 %1197 }
 0xa65   : > { %2687 = vrsqrt.f32 %v1201_v62  ;;  %v1200_v0 = vmul.f32 0.03125, %v1198_v63 }
 0xa67   : > { %v1202_v1 = vadd.f32 1e-05, %v1200_v0 }
 0xa69   : > { %2689 = vrsqrt.f32 %v1202_v1 }
 0xa72   : > { %v2688_v5 = vpop.eup %2687 }
 0xa73   : > { %v1205_v11 = vmul.f32 %v2688_v5, %v1189_v51 }
 0xa75   : > { %v1211_v16 = vmul.f32 %v1210_v7, %v1205_v11 }
 0xa76   : > { %v2690_v13 = vpop.eup %2689 }
 0xa77   : > { %v1206_v15 = vmul.f32 %v2690_v13, %v1190_v54  ;;  %v3055_v20 = vadd.f32 %v1216_v18, %v1211_v16 }
 0xa79   : > { %v1212_v19 = vmul.f32 %v1210_v7, %v1206_v15 }
 0xa7b   : > { %v3057_v21 = vadd.f32 %v1216_v18, %v1212_v19 }
 0xa7d   : > { %v1226_v22 = vpack.c.bf16 %v3057_v21, %v3055_v20 }
 0xa7f   : > { %2499 = vmatmul.mubr.msk.bf16.vlgmr.msra.gmra.mxu1 %vm307_vm2, %v1226_v22 }
 0xa80   : > { %2504 = vmatprep.mubr.msk.bf16.mxu1 %vm2741_vm0, %v2739_v4 }
 0xb3f   : > { %v1280_v24 = vpop.f32.mrf.mxu1 }
 0xb40   : > { %v1281_v26 = vadd.f32 %v1280_v24, %v1230_v32 }
 0xb41   : > { %v2500_v27 = vpop.f32.mrf.mxu1 }
 0xb42   : > { %1290 = vrot.lane.b32.xlu1 %v1281_v26, %s2742_s7 }
 0xb43   : > { %v1283_v3 = vpop.f32.mrf.mxu1 }
 0xb44   : > { %v1284_v29 = vadd.f32 %v1283_v3, %v1230_v32 }
 0xb45   : > { %v2501_v6 = vpop.f32.mrf.mxu1 }
 0xb46   : > { %v3072_v31 = vpack.c.bf16 %v1284_v29, %v1281_v26  ;;  %1292 = vrot.lane.b32.xlu0 %v1284_v29, %s2742_s7 }
 0xbb4   : > { %v1291_v33 = vpop.permute.xlu1 %1290 }
 0xbb5   : > { %1296 = vxpose.xlu1.b32.start [1/2] (short) (narrow) %v1291_v33, 32 }
 0xbb8   : > { %v1293_v34 = vpop.permute.xlu0 %1292 }
 0xbb9   : > { %1297 = vxpose.xlu1.b32.end [2/2] (short) (narrow) %v1293_v34, 32 }
 0xc31   : > { %v1312_v35 = vpop.trf.xlu1 }
 0xc35   : > { %v1313_v36 = vpop.trf.xlu1 }
 0xc36   : > { %v1328_v38 = vpack.c.bf16 %v1313_v36, %v1312_v35 }
 0xc38   : > { %v1334_v17 = vsel %vm399_vm3, %v1328_v38, 0  ;;  %v1453_v1 = vrot.slane %v1328_v38, 4 }
 0xc39   : > { %2503 = vmatpush3.bf16.msra.mxu1 %v1334_v17  ;;  %v1314_v28 = vpop.trf.xlu1 }
 0xc3a   : > { %2508 = vmatprep.subr.bf16.mxu1 %v2739_v4  ;;  %v1458_v13 = vsel %vm399_vm3, %v1453_v1, 0 }
 0xc3c   : > { %2505 = vmatmul.mubr.msk.bf16.vlgmr.msra.gmra.mxu1 %vm395_vm4, %v3072_v31 }
 0xc3d   : > { %2510 = vmatprep.mubr.msk.bf16.mxu1 %vm2741_vm0, %v2739_v4  ;;  %v1315_v56 = vpop.trf.xlu1 }
 0xc3e   : > { %v1329_v15 = vpack.c.bf16 %v1315_v56, %v1314_v28 }
 0xc40   : > { %v1587_v18 = vsel %vm399_vm3, %v1329_v15, 0  ;;  %v1713_v19 = vrot.slane %v1329_v15, 4 }
 0xc42   : > { %v1718_v32 = vsel %vm399_vm3, %v1713_v19, 0 }
 0xcfc   : > { %v1370_v39 = vpop.f32.mrf.mxu1 }
 0xcfd   : > { %v1371_v41 = vadd.f32 %v1370_v39, %v2890_v60 }
 0xcfe   : > { %v2506_v40 = vpop.f32.mrf.mxu1 }
 0xcff   : > { %v1377_v42 = vsel %vm444_vm6, %v1371_v41, -inf }
 0xd00   : > { %1378 = vmax.xlane.f32.xlu0 %v1377_v42  ;;  %v1373_v43 = vpop.f32.mrf.mxu1 }
 0xd01   : > { %v1374_v44 = vadd.f32 %v1373_v43, %v2890_v60 }
 0xd02   : > { %v2507_v45 = vpop.f32.mrf.mxu1 }
 0xd03   : > { %v1380_v46 = vsel %vm444_vm6, %v1374_v44, -inf }
 0xd04   : > { %1381 = vmax.xlane.f32.xlu0 %v1380_v46 }
 0xd89   : > { %v1379_v47 = vpop.xlane.xlu0 %1378 }
 0xd8a   : > { %v1383_v48 = vsub.f32 %v1371_v41, %v1379_v47 }
 0xd8c   : > { %v1385_v49 = vmul.f32 1.442695, %v1383_v48 }
 0xd8d   : > { %v1382_v50 = vpop.xlane.xlu0 %1381 }
 0xd8e   : > { %2691 = vpow2.f32 %v1385_v49  ;;  %v1384_v51 = vsub.f32 %v1374_v44, %v1382_v50 }
 0xd90   : > { %v1387_v52 = vmul.f32 1.442695, %v1384_v51 }
 0xd92   : > { %2693 = vpow2.f32 %v1387_v52 }
 0xd9b   : > { %v2692_v53 = vpop.eup %2691 }
 0xd9c   : > { %v1389_v30 = vsel %vm444_vm6, %v2692_v53, 0.0 }
 0xd9d   : > { %1390 = vadd.xlane.f32.xlu0 %v1389_v30 }
 0xd9f   : > { %v2694_v54 = vpop.eup %2693 }
 0xda0   : > { %v1392_v55 = vsel %vm444_vm6, %v2694_v54, 0.0 }
 0xda1   : > { %1393 = vadd.xlane.f32.xlu1 %v1392_v55 }
 0xdb3   : > { %1401 = vrot.lane.b32.xlu0 %v3072_v31, %s2747_s11 }
 0xdb7   : > { %1450 = vrot.lane.b32.xlu0 %v3072_v31, %s2743_s8 }
 0xdbb   : > { %1581 = vrot.lane.b32.xlu0 %v3072_v31, %s2744_s9 }
 0xdbf   : > { %1710 = vrot.lane.b32.xlu0 %v3072_v31, %s2745_s10 }
 0xe26   : > { %v1391_v59 = vpop.xlane.xlu0 %1390 }
 0xe27   : > { %2695 = vrcp.f32 %v1391_v59 }
 0xe2a   : > { %v1394_v61 = vpop.xlane.xlu1 %1393  ;;  %v1402_v62 = vpop.permute.xlu0 %1401 }
 0xe2b   : > { %2697 = vrcp.f32 %v1394_v61  ;;  %2509 = vmatpush3.bf16.msra.mxu1 %v1402_v62 }
 0xe2c   : > { %2514 = vmatprep.subr.bf16.mxu1 %v2739_v4 }
 0xe2e   : > { %v1451_v16 = vpop.permute.xlu0 %1450 }
 0xe32   : > { %v1582_v22 = vpop.permute.xlu0 %1581 }
 0xe34   : > { %v2696_v63 = vpop.eup %2695 }
 0xe35   : > { %v1397_v5 = vmul.f32 %v2696_v63, %v2692_v53 }
 0xe36   : > { %v1711_v24 = vpop.permute.xlu0 %1710 }
 0xe38   : > { %v2698_v0 = vpop.eup %2697 }
 0xe39   : > { %v1398_v11 = vmul.f32 %v2698_v0, %v2694_v54 }
 0xe3b   : > { %v1399_v7 = vpack.c.bf16 %v1398_v11, %v1397_v5 }
 0xe3d   : > { %2511 = vmatmul.mubr.msk.bf16.vlgmr.msra.gmra.mxu1 %vm444_vm6, %v1399_v7 }
 0xe3e   : > { %2515 = vmatpush3.bf16.msra.mxu1 %v1458_v13  ;;  %2516 = vmatprep.mubr.msk.bf16.mxu1 %vm2741_vm0, %v2739_v4 }
 0xe3f   : > { %2526 = vmatprep.subr.bf16.mxu1 %v2739_v4 }
 0xe45   : > { %2517 = vmatmul.mubr.msk.bf16.vlgmr.msra.gmra.mxu1 %vm395_vm4, %v1451_v16 }
 0xe46   : > { %2527 = vmatpush3.bf16.msra.mxu1 %v1587_v18  ;;  %2528 = vmatprep.mubr.msk.bf16.mxu1 %vm2741_vm0, %v2739_v4 }
 0xe47   : > { %2538 = vmatprep.subr.bf16.mxu1 %v2739_v4 }
 0xe4d   : > { %2529 = vmatmul.mubr.msk.bf16.vlgmr.msra.gmra.mxu1 %vm395_vm4, %v1582_v22 }
 0xe4e   : > { %2539 = vmatpush3.bf16.msra.mxu1 %v1718_v32  ;;  %2540 = vmatprep.mubr.msk.bf16.mxu1 %vm2741_vm0, %v2739_v4 }
 0xe4f   : > { %2550 = vmatprep.subr.bf16.mxu1 %v2739_v4 }
 0xe55   : > { %2541 = vmatmul.mubr.msk.bf16.vlgmr.msra.gmra.mxu1 %vm395_vm4, %v1711_v24 }
 0xe56   : > { %2554 = vmatprep.mubr.msk.bf16.mxu1 %vm2741_vm0, %v2739_v4 }
 0xefd   : > { %v1441_v26 = vpop.f32.mrf.mxu1 }
 0xefe   : > { %1448 = vst.msk [vmem:[#allocation2] sm:$0xff] %vm395_vm4, %v1441_v26 }
 0xeff   : > { %v2512_v27 = vpop.f32.mrf.mxu1 }
 0xf01   : > { %v1444_v3 = vpop.f32.mrf.mxu1 }
 0xf02   : > { %1449 = vst.msk [vmem:[#allocation2 + $0x8] sm:$0xff] %vm395_vm4, %v1444_v3 }
 0xf03   : > { %v2513_v29 = vpop.f32.mrf.mxu1 }
 0xf05   : > { %v1494_v6 = vpop.f32.mrf.mxu1 }
 0xf06   : > { %v1495_v33 = vadd.f32 %v1494_v6, %v2890_v60 }
 0xf07   : > { %v2518_v34 = vpop.f32.mrf.mxu1 }
 0xf08   : > { %v1501_v35 = vsel %vm444_vm6, %v1495_v33, -inf }
 0xf09   : > { %1502 = vmax.xlane.f32.xlu0 %v1501_v35  ;;  %v1497_v36 = vpop.f32.mrf.mxu1 }
 0xf0a   : > { %v1498_v38 = vadd.f32 %v1497_v36, %v2890_v60 }
 0xf0b   : > { %v2519_v17 = vpop.f32.mrf.mxu1 }
 0xf0c   : > { %v1504_v39 = vsel %vm444_vm6, %v1498_v38, -inf }
 0xf0d   : > { %1505 = vmax.xlane.f32.xlu1 %v1504_v39  ;;  %v1623_v41 = vpop.f32.mrf.mxu1 }
 0xf0e   : > { %v1624_v40 = vadd.f32 %v1623_v41, %v2890_v60 }
 0xf0f   : > { %v2530_v42 = vpop.f32.mrf.mxu1 }
 0xf10   : > { %v1630_v43 = vsel %vm444_vm6, %v1624_v40, -inf }
 0xf11   : > { %1631 = vmax.xlane.f32.xlu1 %v1630_v43  ;;  %v1626_v44 = vpop.f32.mrf.mxu1 }
 0xf12   : > { %v1627_v45 = vadd.f32 %v1626_v44, %v2890_v60 }
 0xf13   : > { %v2531_v46 = vpop.f32.mrf.mxu1 }
 0xf14   : > { %v1633_v47 = vsel %vm444_vm6, %v1627_v45, -inf }
 0xf15   : > { %1634 = vmax.xlane.f32.xlu1 %v1633_v47  ;;  %v1754_v48 = vpop.f32.mrf.mxu1 }
 0xf16   : > { %v1755_v49 = vadd.f32 %v1754_v48, %v2890_v60 }
 0xf17   : > { %v2542_v50 = vpop.f32.mrf.mxu1 }
 0xf18   : > { %v1761_v51 = vsel %vm444_vm6, %v1755_v49, -inf }
 0xf19   : > { %1762 = vmax.xlane.f32.xlu1 %v1761_v51  ;;  %v1757_v52 = vpop.f32.mrf.mxu1 }
 0xf1a   : > { %v1758_v53 = vadd.f32 %v1757_v52, %v2890_v60 }
 0xf1b   : > { %v2543_v30 = vpop.f32.mrf.mxu1 }
 0xf1c   : > { %v1764_v54 = vsel %vm444_vm6, %v1758_v53, -inf }
 0xf1d   : > { %1765 = vmax.xlane.f32.xlu1 %v1764_v54 }
 0xf92   : > { %v1503_v55 = vpop.xlane.xlu0 %1502 }
 0xf93   : > { %v1507_v28 = vsub.f32 %v1495_v33, %v1503_v55 }
 0xf95   : > { %v1509_v56 = vmul.f32 1.442695, %v1507_v28 }
 0xf96   : > { %v1506_v59 = vpop.xlane.xlu1 %1505 }
 0xf97   : > { %2699 = vpow2.f32 %v1509_v56  ;;  %v1508_v61 = vsub.f32 %v1498_v38, %v1506_v59 }
 0xf99   : > { %v1511_v62 = vmul.f32 1.442695, %v1508_v61 }
 0xf9a   : > { %v1632_v63 = vpop.xlane.xlu1 %1631 }
 0xf9b   : > { %2701 = vpow2.f32 %v1511_v62  ;;  %v1636_v0 = vsub.f32 %v1624_v40, %v1632_v63 }
 0xf9d   : > { %v1638_v1 = vmul.f32 1.442695, %v1636_v0 }
 0xf9e   : > { %v1635_v5 = vpop.xlane.xlu1 %1634 }
 0xf9f   : > { %2703 = vpow2.f32 %v1638_v1  ;;  %v1637_v11 = vsub.f32 %v1627_v45, %v1635_v5 }
 0xfa1   : > { %v1640_v7 = vmul.f32 1.442695, %v1637_v11 }
 0xfa2   : > { %v1763_v60 = vpop.xlane.xlu1 %1762 }
 0xfa3   : > { %2705 = vpow2.f32 %v1640_v7  ;;  %v1767_v13 = vsub.f32 %v1755_v49, %v1763_v60 }
 0xfa4   : > { %v2700_v15 = vpop.eup %2699 }
 0xfa5   : > { %v1769_v16 = vmul.f32 1.442695, %v1767_v13  ;;  %v1513_v18 = vsel %vm444_vm6, %v2700_v15, 0.0 }
 0xfa6   : > { %1514 = vadd.xlane.f32.xlu0 %v1513_v18  ;;  %v1766_v6 = vpop.xlane.xlu1 %1765 }
 0xfa7   : > { %2707 = vpow2.f32 %v1769_v16  ;;  %v1768_v33 = vsub.f32 %v1758_v53, %v1766_v6  ;;  %v1847_v6 = vrot.slane %v3067_v23, %v2832_v14 }
 0xfa8   : > { %v2702_v19 = vpop.eup %2701 }
 0xfa9   : > { %v1516_v22 = vsel %vm444_vm6, %v2702_v19, 0.0  ;;  %v1771_v34 = vmul.f32 1.442695, %v1768_v33 }
 0xfaa   : > { %1517 = vadd.xlane.f32.xlu1 %v1516_v22 }
 0xfab   : > { %2709 = vpow2.f32 %v1771_v34 }
 0xfac   : > { %v2704_v32 = vpop.eup %2703 }
 0xfad   : > { %v1642_v24 = vsel %vm444_vm6, %v2704_v32, 0.0 }
 0xfae   : > { %1643 = vadd.xlane.f32.xlu0 %v1642_v24 }
 0xfb0   : > { %v2706_v26 = vpop.eup %2705 }
 0xfb1   : > { %v1645_v27 = vsel %vm444_vm6, %v2706_v26, 0.0 }
 0xfb2   : > { %1646 = vadd.xlane.f32.xlu1 %v1645_v27 }
 0xfb4   : > { %v2708_v3 = vpop.eup %2707 }
 0xfb5   : > { %v1773_v29 = vsel %vm444_vm6, %v2708_v3, 0.0 }
 0xfb6   : > { %1774 = vadd.xlane.f32.xlu0 %v1773_v29 }
 0xfb8   : > { %v2710_v35 = vpop.eup %2709 }
 0xfb9   : > { %v1776_v36 = vsel %vm444_vm6, %v2710_v35, 0.0 }
 0xfc3   : > { %1653 = vrot.lane.b32.xlu1 %v3072_v31, %s2748_s12  ;;  %s2256_s12 = sshll.u32 %s3272_s19, 3 }
 0xfcc   : > { %1524 = vrot.lane.b32.xlu0 %v3072_v31, %s2750_s14 }
 0xfe7   : > { %1777 = vadd.xlane.f32.xlu1 %v1776_v36 }
 0xff8   : > { %1784 = vrot.lane.b32.xlu1 %v3072_v31, %s2749_s13 }
0x102f   : > { %v1515_v38 = vpop.xlane.xlu0 %1514 }
0x1030   : > { %2711 = vrcp.f32 %v1515_v38 }
0x1033   : > { %v1518_v17 = vpop.xlane.xlu1 %1517 }
0x1034   : > { %2713 = vrcp.f32 %v1518_v17 }
0x1037   : > { %v1644_v39 = vpop.xlane.xlu0 %1643 }
0x1038   : > { %2715 = vrcp.f32 %v1644_v39 }
0x103b   : > { %v1647_v41 = vpop.xlane.xlu1 %1646 }
0x103c   : > { %2717 = vrcp.f32 %v1647_v41 }
0x103d   : > { %v2712_v40 = vpop.eup %2711 }
0x103e   : > { %v1521_v44 = vmul.f32 %v2712_v40, %v2700_v15 }
0x103f   : > { %v1775_v42 = vpop.xlane.xlu0 %1774  ;;  %v1654_v31 = vpop.permute.xlu1 %1653 }
0x1040   : > { %2719 = vrcp.f32 %v1775_v42 }
0x1041   : > { %v2714_v43 = vpop.eup %2713 }
0x1042   : > { %v1522_v45 = vmul.f32 %v2714_v43, %v2702_v19 }
0x1043   : > { %v1525_v46 = vpop.permute.xlu0 %1524 }
0x1044   : > { %2521 = vmatpush3.bf16.msra.mxu0 %v1525_v46  ;;  %v1523_v47 = vpack.c.bf16 %v1522_v45, %v1521_v44 }
0x1045   : > { %2532 = vmatprep.subr.bf16.mxu0 %v2739_v4  ;;  %v2716_v48 = vpop.eup %2715 }
0x1046   : > { %v1650_v50 = vmul.f32 %v2716_v48, %v2704_v32 }
0x1047   : > { %2523 = vmatmul.mubr.msk.bf16.vlgmr.msra.gmra.mxu0 %vm444_vm6, %v1523_v47 }
0x1048   : > { %2533 = vmatpush3.bf16.msra.mxu0 %v1654_v31  ;;  %2534 = vmatprep.mubr.msk.bf16.mxu0 %vm2741_vm0, %v2739_v4 }
0x1049   : > { %v2718_v49 = vpop.eup %2717  ;;  %2544 = vmatprep.subr.bf16.mxu0 %v2739_v4 }
0x104a   : > { %v1651_v51 = vmul.f32 %v2718_v49, %v2706_v26 }
0x104c   : > { %v1652_v52 = vpack.c.bf16 %v1651_v51, %v1650_v50  ;;  %v2284_v50 = vld [vmem:[%s3267_s2 + $0x38] sm:$0xff]  ;;  %v2281_v51 = vld [vmem:[%s3267_s2 + $0x20] sm:$0xff] }
0x104d   : > { %v2720_v54 = vpop.eup %2719 }
0x104e   : > { %v1781_v28 = vmul.f32 %v2720_v54, %v2708_v3  ;;  %v2641_v54 = vld [vmem:[%s3268_s3 + $0x78] sm:$0xff]  }
0x104f   : > { %2535 = vmatmul.mubr.msk.bf16.vlgmr.msra.gmra.mxu0 %vm444_vm6, %v1652_v52  ;;  %v2282_v52 = vld [vmem:[%s3267_s2 + $0x28] sm:$0xff] }
0x1050   : > { %2546 = vmatprep.mubr.msk.bf16.mxu0 %vm2741_vm0, %v2739_v4 }
0x1070   : > { %v1778_v53 = vpop.xlane.xlu1 %1777 }
0x1071   : > { %2721 = vrcp.f32 %v1778_v53 }
0x1074   : > { %v1785_v30 = vpop.permute.xlu1 %1784 }
0x1075   : > { %2545 = vmatpush3.bf16.msra.mxu0 %v1785_v30  ;;  %v2298_v30 = vcombine.high %v2281_v51, %v2282_v52 }
0x1076   : > { %2558 = vmatprep.subr.bf16.mxu0 %v2739_v4 }
0x107e   : > { %v2722_v55 = vpop.eup %2721 }
0x107f   : > { %v1782_v56 = vmul.f32 %v2722_v55, %v2710_v35  ;;  %v2642_v55 = vld [vmem:[%s3268_s3 + $0x70] sm:$0xff]  }
0x1081   : > { %v1783_v59 = vpack.c.bf16 %v1782_v56, %v1781_v28  ;;  %v2643_v28 = vld [vmem:[%s3268_s3 + $0x68] sm:$0xff]   ;;  %v2644_v56 = vld [vmem:[%s3268_s3 + $0x60] sm:$0xff]  }
0x1083   : > { %2547 = vmatmul.mubr.msk.bf16.vlgmr.msra.gmra.mxu0 %vm444_vm6, %v1783_v59  ;;  %v2645_v59 = vld [vmem:[%s3268_s3 + $0x58] sm:$0xff]  }
0x1084   : > { %2562 = vmatprep.mubr.msk.bf16.mxu0 %vm2741_vm0, %v2739_v4 }
0x1107   : > { %v1564_v61 = vpop.f32.mrf.mxu0 }
0x1108   : > { %1573 = vrot.lane.b32.xlu1 %v1564_v61, %s2751_s21 }
0x1109   : > { %v2524_v62 = vpop.f32.mrf.mxu0 }
0x110b   : > { %v1567_v63 = vpop.f32.mrf.mxu0 }
0x110c   : > { %1575 = vrot.lane.b32.xlu0 %v1567_v63, %s2751_s21 }
0x110d   : > { %v2525_v0 = vpop.f32.mrf.mxu0 }
0x110f   : > { %v1693_v1 = vpop.f32.mrf.mxu0 }
0x1110   : > { %1702 = vrot.lane.b32.xlu1 %v1693_v1, %s2752_s22 }
0x1111   : > { %v2536_v5 = vpop.f32.mrf.mxu0 }
0x1113   : > { %v1696_v11 = vpop.f32.mrf.mxu0 }
0x1114   : > { %1704 = vrot.lane.b32.xlu0 %v1696_v11, %s2752_s22  ;;  %v1929_v11 = vrot.slane %v3067_v23, %v2823_v9  ;;  %v2646_v9 = vld [vmem:[%s3268_s3 + $0x50] sm:$0xff]  }
0x1115   : > { %v2537_v7 = vpop.f32.mrf.mxu0 }
0x1143   : > { %v1824_v60 = vpop.f32.mrf.mxu0 }
0x1144   : > { %1833 = vrot.lane.b32.xlu1 %v1824_v60, %s2753_s23  ;;  %v1935_v60 = vrot.slane %v3067_v23, %v2826_v10  ;;  %v2647_v10 = vld [vmem:[%s3268_s3 + $0x48] sm:$0xff]  }
0x1145   : > { %v2548_v13 = vpop.f32.mrf.mxu0 }
0x1147   : > { %v1827_v15 = vpop.f32.mrf.mxu0 }
0x1148   : > { %1835 = vrot.lane.b32.xlu0 %v1827_v15, %s2753_s23  ;;  %1850 = vrot.lane.b32.xlu1 %v3036_v57, %s2754_s24  ;;  %s222_s23 = scalar_lea.vmem %s3270_s5, %s2256_s12 }
0x1149   : > { %v2549_v16 = vpop.f32.mrf.mxu0 }
0x114c   : > { %1848 = vrot.lane.b32.xlu0 %v3042_v58, %s2754_s24 }
0x117a   : > { %v1574_v18 = vpop.permute.xlu1 %1573 }
0x117b   : > { %1579 = vst.msk [vmem:[#allocation2] sm:$0xff] %vm647_vm7, %v1574_v18 }
0x117e   : > { %v1576_v19 = vpop.permute.xlu0 %1575 }
0x117f   : > { %1580 = vst.msk [vmem:[#allocation2 + $0x8] sm:$0xff] %vm647_vm7, %v1576_v19 }
0x1182   : > { %v1703_v22 = vpop.permute.xlu1 %1702 }
0x1183   : > { %1708 = vst.msk [vmem:[#allocation2] sm:$0xff] %vm777_vm8, %v1703_v22 }
0x1186   : > { %v1705_v32 = vpop.permute.xlu0 %1704 }
0x1187   : > { %1709 = vst.msk [vmem:[#allocation2 + $0x8] sm:$0xff] %vm777_vm8, %v1705_v32 }
0x11b6   : > { %v1834_v24 = vpop.permute.xlu1 %1833 }
0x11b7   : > { %1839 = vst.msk [vmem:[#allocation2] sm:$0xff] %vm909_vm9, %v1834_v24 }
0x11ba   : > { %v1836_v57 = vpop.permute.xlu0 %1835  ;;  %v1851_v26 = vpop.permute.xlu1 %1850 }
0x11bb   : > { %1840 = vst.msk [vmem:[#allocation2 + $0x8] sm:$0xff] %vm909_vm9, %v1836_v57  ;;  %2551 = vmatpush3.bf16.msra.mxu1 %v1851_v26  ;;  %v2648_v57 = vld [vmem:[%s3268_s3 + $0x40] sm:$0xff]   ;;  %v1942_v26 = vrot.slane %v3067_v23, %v3019_v25 }
0x11bc   : > { %2552 = vmatprep.subr.bf16.mxu1 %v2739_v4 }
0x11be   : > { %v1849_v58 = vpop.permute.xlu0 %1848  ;;  %v1841_v27 = vld [vmem:[#allocation2] sm:$0xff] }
0x11bf   : > { %2553 = vmatpush3.bf16.msra.mxu1 %v1849_v58 }
0x11c0   : > { %2566 = vmatprep.subr.bf16.mxu1 %v2739_v4 }
0x11c2   : > { %v1842_v3 = vld [vmem:[#allocation2 + $0x8] sm:$0xff] }
0x11c3   : > { %v1843_v29 = vpack.c.bf16 %v1842_v3, %v1841_v27 }
0x11c5   : > { %2555 = vmatmul.mubr.msk.bf16.vlgmr.msra.gmra.mxu1 %vm307_vm2, %v1843_v29 }
0x11c6   : > { %2582 = vmatprep.mubr.msk.bf16.mxu1 %vm2741_vm0, %v2739_v4  ;;  %2567 = vmatpush3.bf16.msra.mxu1 %v2641_v54 }
0x11c7   : > { %2568 = vmatprep.subr.bf16.mxu1 %v2739_v4 }
0x11ca   : > { %2569 = vmatpush3.bf16.msra.mxu1 %v2642_v55 }
0x11cb   : > { %2570 = vmatprep.subr.bf16.mxu1 %v2739_v4 }
0x11ce   : > { %2571 = vmatpush3.bf16.msra.mxu1 %v2643_v28 }
0x11cf   : > { %2572 = vmatprep.subr.bf16.mxu1 %v2739_v4 }
0x11d2   : > { %2573 = vmatpush3.bf16.msra.mxu1 %v2644_v56 }
0x11d3   : > { %2574 = vmatprep.subr.bf16.mxu1 %v2739_v4 }
0x11d6   : > { %2575 = vmatpush3.bf16.msra.mxu1 %v2645_v59 }
0x11d7   : > { %2576 = vmatprep.subr.bf16.mxu1 %v2739_v4 }
0x11da   : > { %2577 = vmatpush3.bf16.msra.mxu1 %v2646_v9 }
0x11db   : > { %2578 = vmatprep.subr.bf16.mxu1 %v2739_v4 }
0x11de   : > { %2579 = vmatpush3.bf16.msra.mxu1 %v2647_v10 }
0x11df   : > { %2580 = vmatprep.subr.bf16.mxu1 %v2739_v4 }
0x11e2   : > { %2581 = vmatpush3.bf16.msra.mxu1 %v2648_v57 }
0x1285   : > { %v1891_v33 = vpop.f32.mrf.mxu1 }
0x1286   : > { %v1892_v34 = vadd.f32 %v1891_v33, %v1847_v6 }
0x1287   : > { %v2556_v35 = vpop.f32.mrf.mxu1 }
0x1288   : > { %v1898_v36 = vadd.f32 %v1892_v34, %v3055_v20 }
0x1289   : > { %v1894_v38 = vpop.f32.mrf.mxu1 }
0x128a   : > { %v1895_v17 = vadd.f32 %v1894_v38, %v1847_v6  ;;  %v1900_v39 = vsel %vm307_vm2, %v1898_v36, 0.0  ;;  %v2018_v38 = vrot.slane %v3067_v23, %v1088_v37  ;;  %v2649_v37 = vld [vmem:[%s3269_s4 + $0x8] sm:$0xff]  }
0x128b   : > { %1901 = vadd.xlane.f32.xlu1 %v1900_v39  ;;  %v2557_v41 = vpop.f32.mrf.mxu1 }
0x128c   : > { %v1899_v40 = vadd.f32 %v1895_v17, %v3057_v21  ;;  %v2283_v21 = vld [vmem:[%s3267_s2 + $0x30] sm:$0xff] }
0x128d   : > { %v2299_v53 = vcombine.high %v2283_v21, %v2284_v50  ;;  %v2124_v50 = vrot.slane %v3067_v23, %v1209_v2 }
0x128e   : > { %v1903_v42 = vsel %vm307_vm2, %v1899_v40, 0.0 }
0x128f   : > { %1904 = vadd.xlane.f32.xlu0 %v1903_v42  ;;  %2559 = vmatpush3.bf16.msra.mxu0 %v2299_v53  ;;  %v2129_v53 = vrot.slane %v3067_v23, %v1215_v12 }
0x1290   : > { %2560 = vmatprep.subr.bf16.mxu0 %v2739_v4 }
0x1293   : > { %2561 = vmatpush3.bf16.msra.mxu0 %v2298_v30 }
0x1294   : > { %2586 = vmatprep.subr.bf16.mxu0 %v2739_v4 }
0x1314   : > { %v1902_v43 = vpop.xlane.xlu1 %1901 }
0x1315   : > { %v1906_v44 = vmul.f32 0.03125, %v1902_v43 }
0x1317   : > { %v1908_v45 = vsub.f32 %v1898_v36, %v1906_v44 }
0x1318   : > { %v1905_v14 = vpop.xlane.xlu0 %1904 }
0x1319   : > { %v1907_v46 = vmul.f32 0.03125, %v1905_v14  ;;  %v1910_v47 = vmul.f32 %v1908_v45, %v1908_v45 }
0x131b   : > { %v1909_v48 = vsub.f32 %v1899_v40, %v1907_v46  ;;  %v1912_v20 = vsel %vm307_vm2, %v1910_v47, 0.0 }
0x131c   : > { %1913 = vadd.xlane.f32.xlu0 %v1912_v20  ;;  %v2650_v20 = vld [vmem:[%s3269_s4] sm:$0xff]  }
0x131d   : > { %v1911_v31 = vmul.f32 %v1909_v48, %v1909_v48 }
0x131f   : > { %v1915_v49 = vsel %vm307_vm2, %v1911_v31, 0.0 }
0x1320   : > { %1916 = vadd.xlane.f32.xlu0 %v1915_v49 }
0x13a5   : > { %v1914_v61 = vpop.xlane.xlu0 %1913 }
0x13a6   : > { %v1918_v62 = vmul.f32 0.03125, %v1914_v61 }
0x13a8   : > { %v1920_v63 = vadd.f32 1e-05, %v1918_v62 }
0x13a9   : > { %v1917_v0 = vpop.xlane.xlu0 %1916 }
0x13aa   : > { %2723 = vrsqrt.f32 %v1920_v63  ;;  %v1919_v1 = vmul.f32 0.03125, %v1917_v0 }
0x13ac   : > { %v1921_v5 = vadd.f32 1e-05, %v1919_v1 }
0x13ae   : > { %2725 = vrsqrt.f32 %v1921_v5 }
0x13b7   : > { %v2724_v7 = vpop.eup %2723 }
0x13b8   : > { %v1924_v13 = vmul.f32 %v2724_v7, %v1908_v45 }
0x13ba   : > { %v1930_v15 = vmul.f32 %v1929_v11, %v1924_v13 }
0x13bb   : > { %v2726_v16 = vpop.eup %2725 }
0x13bc   : > { %v1925_v18 = vmul.f32 %v2726_v16, %v1909_v48  ;;  %v1936_v19 = vadd.f32 %v1935_v60, %v1930_v15 }
0x13be   : > { %v1931_v22 = vmul.f32 %v1929_v11, %v1925_v18 }
0x13c0   : > { %v1937_v32 = vadd.f32 %v1935_v60, %v1931_v22 }
0x13c2   : > { %v1938_v24 = vpack.c.bf16 %v1937_v32, %v1936_v19 }
0x13c4   : > { %2563 = vmatmul.mubr.msk.bf16.vlgmr.msra.gmra.mxu0 %vm307_vm2, %v1938_v24 }
0x13c5   : > { %2590 = vmatprep.mubr.msk.bf16.mxu0 %vm2741_vm0, %v2739_v4  ;;  %2587 = vmatpush3.bf16.msra.mxu0 %v2649_v37 }
0x13c6   : > { %2588 = vmatprep.subr.bf16.mxu0 %v2739_v4  ;;  %v2729_v4 = vld [vmem:[%s3266_s1 + $0x10] sm:$0xff] }
0x13c7   : > { %v2139_v28 = vrot.slane %v2729_v4, %v3019_v25 }
0x13c9   : > { %2589 = vmatpush3.bf16.msra.mxu0 %v2650_v20 }
0x1484   : > { %v1988_v58 = vpop.f32.mrf.mxu0 }
0x1485   : > { %v1989_v3 = vadd.f32 %v1988_v58, %v1942_v26 }
0x1486   : > { %v2564_v27 = vpop.f32.mrf.mxu0 }
0x1487   : > { %v1995_v34 = vmax.f32 %v1989_v3, 0.0 }
0x1488   : > { %v1991_v29 = vpop.f32.mrf.mxu0 }
0x1489   : > { %v1992_v6 = vadd.f32 %v1991_v29, %v1942_v26 }
0x148a   : > { %v2565_v33 = vpop.f32.mrf.mxu0 }
0x148b   : > { %v1996_v35 = vmax.f32 %v1992_v6, 0.0 }
0x148d   : > { %v1997_v36 = vpack.c.bf16 %v1996_v35, %v1995_v34 }
0x148f   : > { %2583 = vmatmul.mubr.bf16.vlgmr.msra.gmra.mxu1 %v1997_v36 }
0x154f   : > { %v2101_v17 = vpop.f32.mrf.mxu1 }
0x1550   : > { %v2102_v39 = vadd.f32 %v2101_v17, %v2018_v38 }
0x1551   : > { %v2584_v41 = vpop.f32.mrf.mxu1 }
0x1552   : > { %v2107_v40 = vadd.f32 %v2102_v39, %v1936_v19 }
0x1553   : > { %v2104_v42 = vpop.f32.mrf.mxu1 }
0x1554   : > { %v2108_v43 = vsel %vm307_vm2, %v2107_v40, 0.0 }
0x1555   : > { %2109 = vadd.xlane.f32.xlu1 %v2108_v43  ;;  %v2585_v44 = vpop.f32.mrf.mxu1 }
0x15de   : > { %v2110_v45 = vpop.xlane.xlu1 %2109 }
0x15df   : > { %v2111_v14 = vmul.f32 0.03125, %v2110_v45 }
0x15e1   : > { %v2112_v46 = vsub.f32 %v2107_v40, %v2111_v14 }
0x15e3   : > { %v2113_v47 = vmul.f32 %v2112_v46, %v2112_v46 }
0x15e5   : > { %v2114_v48 = vsel %vm307_vm2, %v2113_v47, 0.0 }
0x15e6   : > { %2115 = vadd.xlane.f32.xlu0 %v2114_v48 }
0x166f   : > { %v2116_v31 = vpop.xlane.xlu0 %2115 }
0x1670   : > { %v2117_v49 = vmul.f32 0.03125, %v2116_v31 }
0x1672   : > { %v2118_v21 = vadd.f32 1e-05, %v2117_v49 }
0x1674   : > { %2727 = vrsqrt.f32 %v2118_v21 }
0x1681   : > { %v2728_v51 = vpop.eup %2727 }
0x1682   : > { %v2120_v52 = vmul.f32 %v2728_v51, %v2112_v46 }
0x1684   : > { %v2125_v30 = vmul.f32 %v2124_v50, %v2120_v52 }
0x1686   : > { %v2130_v54 = vadd.f32 %v2129_v53, %v2125_v30 }
0x1688   : > { %v2131_v55 = vpack.c.bf16 %v2130_v54, %v2130_v54 }
0x168a   : > { %2591 = vmatmul.mubr.msk.bf16.vlgmr.msra.gmra.mxu0 %vm307_vm2, %v2131_v55 }
0x174a   : > { %v2189_v2 = vpop.f32.mrf.mxu0 }
0x174b   : > { %v2190_v8 = vadd.f32 %v2189_v2, %v2139_v28 }
0x174c   : > { %v2592_v56 = vpop.f32.mrf.mxu0 }
0x174d   : > { %2195 = vst [vmem:[%s222_s23] sm:$0xff] %v2190_v8 }
0x174e   : > { %v2192_v12 = vpop.f32.mrf.mxu0 }
0x1750   : > { %v2593_v23 = vpop.f32.mrf.mxu0 }
0x1751 PF: > { %s15_s18 = sadd.s32 1, %s2736_s18  }
0x1752   : > { %p12_p4 = scmp.ge.s32.totalorder %s15_s18, 4  }
0x1754   :  { %14 = sbr.rel (!%p12_p4) target bundleno = 1 (0x1), region = 74 }

</bundles_post_ra>
